<compile_context>
chip_gen: v6e
topology: v6e:2x2x1
jax: 0.10.0
libtpu: 0.0.40
codegen_flags: <defaults>
</compile_context>

<pallas_src>
import jax
import jax.numpy as jnp
from jax.experimental import pallas as pl
from jax.experimental.pallas import tpu as pltpu


# ---------------------------------------------------------------------------
# Kernels
# ---------------------------------------------------------------------------
def _detect_head_nchw_kernel(x_ref, w_ref, b_ref, o_ref):
    """Fast path: x_ref is (C, T) — channels on sublanes, HW lane-dense."""
    x = x_ref[...].astype(jnp.float32)          # (C, T)
    w = w_ref[...].astype(jnp.float32)          # (C, F)
    b = b_ref[...].astype(jnp.float32)          # (1, F)
    # Contract over the channel axis (dim 0 of both): (C,T) x (C,F) -> (T,F).
    # The MXU performs the activation "transpose" implicitly; no physical
    # NCHW->NHWC transpose of the input is ever materialized in HBM.
    logits = jax.lax.dot_general(
        x, w,
        dimension_numbers=(((0,), (0,)), ((), ())),
        preferred_element_type=jnp.float32,
    )
    # sigmoid -> EUP (exp) + VPU; identical op to the reference for bitwise-
    # comparable results in the f32 path.
    o_ref[...] = jax.nn.sigmoid(logits + b).astype(o_ref.dtype)


def _detect_head_rows_kernel(x_ref, w_ref, b_ref, o_ref):
    """Fallback path: x_ref is (T, C) — standard NN matmul (proven lowering)."""
    x = x_ref[...].astype(jnp.float32)          # (T, C)
    w = w_ref[...].astype(jnp.float32)          # (C, F)
    b = b_ref[...].astype(jnp.float32)          # (1, F)
    logits = jnp.dot(x, w, preferred_element_type=jnp.float32)
    o_ref[...] = jax.nn.sigmoid(logits + b).astype(o_ref.dtype)


# ---------------------------------------------------------------------------
# Wrappers
# ---------------------------------------------------------------------------
_VMEM_LIMIT = 32 * 1024 * 1024


def _pick_tile(total, target, granule=128):
    """Full extent if small, else the largest multiple of `granule` <= target."""
    total, target = int(total), int(target)
    if total <= target or total < granule:
        return total
    return max(granule, (min(target, total) // granule) * granule)


def _cost(n_rows, ch, out_feat, in_bytes, out_itemsize):
    return pl.CostEstimate(
        flops=2 * n_rows * ch * out_feat,
        transcendentals=n_rows * out_feat,                 # one exp per sigmoid
        bytes_accessed=int(in_bytes) + (ch + 1) * out_feat * 4
        + n_rows * out_feat * out_itemsize,
    )


def _forward_nchw_direct(im, w32, b32, out_dtype, hw_tile_target):
    """Reads NCHW directly; output is (B, H*W, F)."""
    bsz, ch, h, w = im.shape
    hw = h * w
    out_feat = w32.shape[1]
    x3 = im.reshape(bsz, ch, hw)                           # free view of NCHW
    tile = _pick_tile(hw, hw_tile_target)
    # VMEM sanity: the output block lane-pads F->128, so the double-buffered
    # output costs ~ tile * 128 * 4 * 2 bytes; shrink the tile if it would not
    # leave headroom for inputs + intermediates under the scoped limit.
    while tile > 512 and tile * 128 * 4 * 2 > _VMEM_LIMIT // 2:
        tile //= 2
    grid = (bsz, pl.cdiv(hw, tile))
    return pl.pallas_call(
        _detect_head_nchw_kernel,
        out_shape=jax.ShapeDtypeStruct((bsz, hw, out_feat), out_dtype),
        grid_spec=pltpu.PrefetchScalarGridSpec(
            num_scalar_prefetch=0,
            grid=grid,
            in_specs=[
                # (C, tile) block: C=3 pads only 3->8 sublanes, HW lane-dense,
                # fully contiguous DMA straight out of the NCHW layout.
                pl.BlockSpec((None, ch, tile), lambda b, i: (b, 0, i)),
                # Tiny weight / bias: same block every step (fetched once,
                # stays resident in VMEM).
                pl.BlockSpec((ch, out_feat), lambda b, i: (0, 0)),
                pl.BlockSpec((1, out_feat), lambda b, i: (0, 0)),
            ],
            out_specs=pl.BlockSpec((None, tile, out_feat),
                                   lambda b, i: (b, i, 0)),
        ),
        compiler_params=pltpu.CompilerParams(
            # Both axes independent -> shardable across v7x's 2 TensorCores.
            dimension_semantics=("parallel", "parallel"),
            vmem_limit_bytes=_VMEM_LIMIT,
        ),
        cost_estimate=_cost(bsz * hw, ch, out_feat,
                            im.size * im.dtype.itemsize,
                            jnp.dtype(out_dtype).itemsize),
    )(x3, w32, b32)


def _forward_rows_fallback(im, w32, b32, out_dtype, hw_tile_target):
    """Previously-validated layout (wrapper transpose); output is (B, H*W, F)."""
    bsz, ch, h, w = im.shape
    hw = h * w
    out_feat = w32.shape[1]
    # NCHW -> NHWC -> (B*H*W, C): layout plumbing in XLA (one extra HBM pass).
    x2 = jnp.transpose(im, (0, 2, 3, 1)).reshape(bsz * hw, ch)
    n_rows = bsz * hw
    tile = _pick_tile(n_rows, hw_tile_target)
    while tile > 512 and tile * 128 * 4 * 2 > _VMEM_LIMIT // 2:
        tile //= 2
    out2 = pl.pallas_call(
        _detect_head_rows_kernel,
        out_shape=jax.ShapeDtypeStruct((n_rows, out_feat), out_dtype),
        grid_spec=pltpu.PrefetchScalarGridSpec(
            num_scalar_prefetch=0,
            grid=(pl.cdiv(n_rows, tile),),
            in_specs=[
                pl.BlockSpec((tile, ch), lambda i: (i, 0)),
                pl.BlockSpec((ch, out_feat), lambda i: (0, 0)),
                pl.BlockSpec((1, out_feat), lambda i: (0, 0)),
            ],
            out_specs=pl.BlockSpec((tile, out_feat), lambda i: (i, 0)),
        ),
        compiler_params=pltpu.CompilerParams(
            dimension_semantics=("parallel",),
            vmem_limit_bytes=_VMEM_LIMIT,
        ),
        cost_estimate=_cost(n_rows, ch, out_feat,
                            im.size * im.dtype.itemsize,
                            jnp.dtype(out_dtype).itemsize),
    )(x2, w32, b32)
    return out2.reshape(bsz, hw, out_feat)


_NCHW_DIRECT_OK = None  # compile-once cache for the fast path


def yolov5_triton_forward(im, weight, bias, *, na, nc, fp16=False,
                          out_dtype=None, hw_tile=8192):
    """Pallas implementation of Yolov5Triton.forward.

    im:     (B, C, H, W) NCHW image (torch convention), typically float32.
    weight: (C, na*(5+nc)) detect-head 1x1-conv weights (stand-in for the
            remotely-served model).
    bias:   (na*(5+nc),)   detect-head bias.
    returns (B, H*W*na, 5+nc) sigmoid-activated detections (YOLOv5 inference
            output shape).  Output dtype is bf16 when fp16=True else float32
            (override with out_dtype).
    """
    global _NCHW_DIRECT_OK
    bsz, ch, h, w = im.shape
    out_feat = na * (5 + nc)
    assert weight.shape == (ch, out_feat), weight.shape
    assert bias.shape == (out_feat,), bias.shape
    hw = h * w

    # TODO(synk): torch.float16 has no TPU equivalent; fp16 is approximated by
    # a bfloat16 OUTPUT.  The original wrapper-side `im.half()` pass is folded
    # into the kernel (it upcasts to f32 internally), removing one full HBM
    # read+write pass over the input.
    if out_dtype is None:
        out_dtype = jnp.bfloat16 if fp16 else jnp.float32

    w32 = weight.astype(jnp.float32)
    b32 = bias.reshape(1, out_feat).astype(jnp.float32)

    out = None
    if _NCHW_DIRECT_OK is not False:
        try:
            out = _forward_nchw_direct(im, w32, b32, out_dtype, hw_tile)
            _NCHW_DIRECT_OK = True
        except Exception:
            # Transposed-LHS dot_general not supported by this toolchain:
            # fall back to the previously-validated row-major formulation.
            _NCHW_DIRECT_OK = False
    if out is None:
        out = _forward_rows_fallback(im, w32, b32, out_dtype, hw_tile)

    # (B, H*W, na*(5+nc)) -> (B, H*W*na, 5+nc): contiguous, free reshape.
    # NOTE: cell-major / anchor-minor ordering; verify downstream NMS layout.
    return out.reshape(bsz, hw * na, 5 + nc)


# ---------------------------------------------------------------------------
# Pure-JAX reference & demo
# ---------------------------------------------------------------------------
def _reference(im, weight, bias, *, na, nc, out_dtype):
    b, ch, h, w = im.shape
    x = jnp.transpose(im.astype(jnp.float32), (0, 2, 3, 1)).reshape(-1, ch)
    logits = x @ weight.astype(jnp.float32) + bias.astype(jnp.float32)
    y = jax.nn.sigmoid(logits).astype(out_dtype)
    return y.reshape(b, h * w * na, 5 + nc)


if __name__ == "__main__":
    key = jax.random.PRNGKey(0)
    k_im, k_w, k_b = jax.random.split(key, 3)

    # Small YOLOv5-style input: batch=2, 3 channels, 16x16 spatial.
    B, C, H, W = 2, 3, 16, 16
    NA, NC = 3, 4                       # 3 anchors, 4 classes -> 27 output feats
    F = NA * (5 + NC)

    im = jax.random.normal(k_im, (B, C, H, W), dtype=jnp.float32)
    # Deterministic synthetic stand-in weights for the remotely-served model.
    weight = 0.1 * jax.random.normal(k_w, (C, F), dtype=jnp.float32)
    bias = 0.05 * jax.random.normal(k_b, (F,), dtype=jnp.float32)

    # fp32 path (float32 output).
    y = jax.block_until_ready(
        yolov5_triton_forward(im, weight, bias, na=NA, nc=NC, fp16=False))
    y_ref = _reference(im, weight, bias, na=NA, nc=NC, out_dtype=jnp.float32)
    assert y.shape == (B, H * W * NA, 5 + NC), y.shape
    assert y.dtype == jnp.float32, y.dtype
    assert jnp.allclose(y, y_ref, atol=1e-5, rtol=1e-5)

    # fp16 path (bf16 output, no wrapper-side cast pass).
    y16 = jax.block_until_ready(
        yolov5_triton_forward(im, weight, bias, na=NA, nc=NC, fp16=True))
    y16_ref = _reference(im, weight, bias, na=NA, nc=NC, out_dtype=jnp.bfloat16)
    assert y16.dtype == jnp.bfloat16, y16.dtype
    assert jnp.allclose(y16.astype(jnp.float32), y16_ref.astype(jnp.float32),
                        atol=1e-2, rtol=1e-2)

    print("KERNEL_OK")
</pallas_src>

<mosaic_0001>
module attributes {stable_mosaic.version = 11 : i64} {
  func.func @_detect_head_nchw_kernel(%arg0: i32, %arg1: i32, %arg2: memref<1x3x256xf32, #tpu.memory_space<vmem>>, %arg3: memref<3x27xf32, #tpu.memory_space<vmem>>, %arg4: memref<1x27xf32, #tpu.memory_space<vmem>>, %arg5: memref<1x256x27xf32, #tpu.memory_space<vmem>>) attributes {dimension_semantics = [#tpu.dimension_semantics<parallel>, #tpu.dimension_semantics<parallel>], iteration_bounds = array<i64: 2, 1>, scalar_prefetch = 0 : i64, scratch_operands = 0 : i64, tpu.core_type = #tpu.core_type<tc>, window_params = [{transform_indices = @transform_0, window_bounds = array<i64: 1, 3, 256>}, {pipeline_mode = #tpu.pipeline_mode<synchronous>, transform_indices = @transform_1, window_bounds = array<i64: 3, 27>}, {pipeline_mode = #tpu.pipeline_mode<synchronous>, transform_indices = @transform_2, window_bounds = array<i64: 1, 27>}, {transform_indices = @transform_3, window_bounds = array<i64: 1, 256, 27>}]} {
    %c0 = arith.constant 0 : index
    %c0_0 = arith.constant 0 : index
    %c0_1 = arith.constant 0 : index
    %0 = vector.load %arg2[%c0, %c0_0, %c0_1] : memref<1x3x256xf32, #tpu.memory_space<vmem>>, vector<1x3x256xf32>
    %1 = vector.shape_cast %0 : vector<1x3x256xf32> to vector<3x256xf32>
    %c0_2 = arith.constant 0 : index
    %c0_3 = arith.constant 0 : index
    %2 = vector.load %arg3[%c0_2, %c0_3] : memref<3x27xf32, #tpu.memory_space<vmem>>, vector<3x27xf32>
    %c0_4 = arith.constant 0 : index
    %c0_5 = arith.constant 0 : index
    %3 = vector.load %arg4[%c0_4, %c0_5] : memref<1x27xf32, #tpu.memory_space<vmem>>, vector<1x27xf32>
    %cst = arith.constant dense<0.000000e+00> : vector<256x27xf32>
    %4 = tpu.matmul %1, %2, %cst {dimension_numbers = #tpu.dot_dimension_numbers<[0], [0], [1], [1], [0, 1, 1, 1], [], []>} : vector<3x256xf32>, vector<3x27xf32>, vector<256x27xf32> -> vector<256x27xf32>
    %5 = vector.broadcast %3 : vector<1x27xf32> to vector<256x27xf32>
    %6 = arith.addf %4, %5 : vector<256x27xf32>
    %7 = arith.negf %6 : vector<256x27xf32>
    %8 = math.exp %7 : vector<256x27xf32>
    %cst_6 = arith.constant 1.000000e+00 : f32
    %9 = vector.broadcast %cst_6 : f32 to vector<256x27xf32>
    %10 = arith.addf %9, %8 : vector<256x27xf32>
    %11 = arith.divf %9, %10 : vector<256x27xf32>
    %c0_7 = arith.constant 0 : index
    %c0_8 = arith.constant 0 : index
    %c0_9 = arith.constant 0 : index
    %12 = vector.load %arg5[%c0_7, %c0_8, %c0_9] : memref<1x256x27xf32, #tpu.memory_space<vmem>>, vector<1x256x27xf32>
    %13 = vector.shape_cast %12 : vector<1x256x27xf32> to vector<256x27xf32>
    %14 = vector.shape_cast %11 : vector<256x27xf32> to vector<1x256x27xf32>
    tpu.vector_store %arg5[%c0_7, %c0_8, %c0_9], %14 {strides = array<i32>} : memref<1x256x27xf32, #tpu.memory_space<vmem>>, vector<1x256x27xf32>,
    return
  }
  func.func @transform_0(%arg0: i32, %arg1: i32) -> (i32, i32, i32) {
    %c0_i32 = arith.constant 0 : i32
    %c0_i32_0 = arith.constant 0 : i32
    return %arg0, %c0_i32, %arg1 : i32, i32, i32
  }
  func.func @transform_1(%arg0: i32, %arg1: i32) -> (i32, i32) {
    %c0_i32 = arith.constant 0 : i32
    %c0_i32_0 = arith.constant 0 : i32
    %c0_i32_1 = arith.constant 0 : i32
    return %c0_i32, %c0_i32_0 : i32, i32
  }
  func.func @transform_2(%arg0: i32, %arg1: i32) -> (i32, i32) {
    %c0_i32 = arith.constant 0 : i32
    %c0_i32_0 = arith.constant 0 : i32
    %c0_i32_1 = arith.constant 0 : i32
    return %c0_i32, %c0_i32_0 : i32, i32
  }
  func.func @transform_3(%arg0: i32, %arg1: i32) -> (i32, i32, i32) {
    %c0_i32 = arith.constant 0 : i32
    %c0_i32_0 = arith.constant 0 : i32
    return %arg0, %arg1, %c0_i32 : i32, i32, i32
  }
}

module attributes {stable_mosaic.version = 11 : i64} {
  func.func @_detect_head_rows_kernel(%arg0: i32, %arg1: memref<512x3xf32, #tpu.memory_space<vmem>>, %arg2: memref<3x27xf32, #tpu.memory_space<vmem>>, %arg3: memref<1x27xf32, #tpu.memory_space<vmem>>, %arg4: memref<512x27xf32, #tpu.memory_space<vmem>>) attributes {dimension_semantics = [#tpu.dimension_semantics<parallel>], iteration_bounds = array<i64: 1>, scalar_prefetch = 0 : i64, scratch_operands = 0 : i64, tpu.core_type = #tpu.core_type<tc>, window_params = [{transform_indices = @transform_0, window_bounds = array<i64: 512, 3>}, {pipeline_mode = #tpu.pipeline_mode<synchronous>, transform_indices = @transform_1, window_bounds = array<i64: 3, 27>}, {pipeline_mode = #tpu.pipeline_mode<synchronous>, transform_indices = @transform_2, window_bounds = array<i64: 1, 27>}, {transform_indices = @transform_3, window_bounds = array<i64: 512, 27>}]} {
    %c0 = arith.constant 0 : index
    %c0_0 = arith.constant 0 : index
    %0 = vector.load %arg1[%c0, %c0_0] : memref<512x3xf32, #tpu.memory_space<vmem>>, vector<512x3xf32>
    %c0_1 = arith.constant 0 : index
    %c0_2 = arith.constant 0 : index
    %1 = vector.load %arg2[%c0_1, %c0_2] : memref<3x27xf32, #tpu.memory_space<vmem>>, vector<3x27xf32>
    %c0_3 = arith.constant 0 : index
    %c0_4 = arith.constant 0 : index
    %2 = vector.load %arg3[%c0_3, %c0_4] : memref<1x27xf32, #tpu.memory_space<vmem>>, vector<1x27xf32>
    %cst = arith.constant dense<0.000000e+00> : vector<512x27xf32>
    %3 = tpu.matmul %0, %1, %cst {dimension_numbers = #tpu.dot_dimension_numbers<[1], [0], [0], [1], [0, 0, 1, 1], [], []>} : vector<512x3xf32>, vector<3x27xf32>, vector<512x27xf32> -> vector<512x27xf32>
    %4 = vector.broadcast %2 : vector<1x27xf32> to vector<512x27xf32>
    %5 = arith.addf %3, %4 : vector<512x27xf32>
    %6 = arith.negf %5 : vector<512x27xf32>
    %7 = math.exp %6 : vector<512x27xf32>
    %cst_5 = arith.constant 1.000000e+00 : f32
    %8 = vector.broadcast %cst_5 : f32 to vector<512x27xf32>
    %9 = arith.addf %8, %7 : vector<512x27xf32>
    %10 = arith.divf %8, %9 : vector<512x27xf32>
    %c0_6 = arith.constant 0 : index
    %c0_7 = arith.constant 0 : index
    %11 = vector.load %arg4[%c0_6, %c0_7] : memref<512x27xf32, #tpu.memory_space<vmem>>, vector<512x27xf32>
    tpu.vector_store %arg4[%c0_6, %c0_7], %10 {strides = array<i32>} : memref<512x27xf32, #tpu.memory_space<vmem>>, vector<512x27xf32>,
    return
  }
  func.func @transform_0(%arg0: i32) -> (i32, i32) {
    %c0_i32 = arith.constant 0 : i32
    %c0_i32_0 = arith.constant 0 : i32
    return %arg0, %c0_i32 : i32, i32
  }
  func.func @transform_1(%arg0: i32) -> (i32, i32) {
    %c0_i32 = arith.constant 0 : i32
    %c0_i32_0 = arith.constant 0 : i32
    %c0_i32_1 = arith.constant 0 : i32
    return %c0_i32, %c0_i32_0 : i32, i32
  }
  func.func @transform_2(%arg0: i32) -> (i32, i32) {
    %c0_i32 = arith.constant 0 : i32
    %c0_i32_0 = arith.constant 0 : i32
    %c0_i32_1 = arith.constant 0 : i32
    return %c0_i32, %c0_i32_0 : i32, i32
  }
  func.func @transform_3(%arg0: i32) -> (i32, i32) {
    %c0_i32 = arith.constant 0 : i32
    %c0_i32_0 = arith.constant 0 : i32
    return %arg0, %c0_i32 : i32, i32
  }
}

</mosaic_0001>

<bundles_post_ra>
// kernel: tpu_custom_call.1
= control target key start
LH: loop header
LB: loop body
LE: loop exit
PB: predicated region body
PF: predicated region fallthrough
CT: control target
= control target key end

     0   :  { %s1286_s12 = smov 0   ;;  %s1288_s13 = smov 0   ;;  %s1461_s0 = inlined_call_operand.vmem [shape: f32[2,3,256], index: 0, kind: input, shape index: {}]   ;;  %s1462_s1 = inlined_call_operand.vmem [shape: f32[3,27], index: 1, kind: input, shape index: {}]   ;;  %s1463_s2 = inlined_call_operand.vmem [shape: f32[1,27], index: 2, kind: input, shape index: {}]   ;;  %s1464_s3 = inlined_call_operand.vmem [shape: f32[2,256,27], index: 3, kind: output, shape index: {}]  }
   0x1   :  { %s1290_s14 = smov 0  }
   0x2 LB: > { %s25_s15 = sadd.s32 1, %s1260_s13  ;;  %p928_p0 = scmp.ge.s32.totalorder %s1264_s14, 1  ;;  %s1264_s14 = sphi %s1290_s14, %s13_s14   ;;  %s1260_s13 = sphi %s1288_s13, %s1466_s13   ;;  %s1256_s12 = sphi %s1286_s12, %s1465_s12  }
   0x3   : > { %p27_p1 = scmp.ge.s32.totalorder %s25_s15, 2  ;;  %p158_p2 = scmp.lt.s32.totalorder %s1264_s14, 3 }
   0x5   : > { %s1468_s15 = smov (%p27_p1, %s25_s15), 0  ;;  %p159_p3 = pnand %p928_p0, %p158_p2 }
   0x6   : > { %p191_p4 = scmp.lt.s32.totalorder (!%p159_p3), %s1256_s12, 1 }
   0x7   : > { %162 = sbr.rel (%p159_p3) target bundleno = 496 (0x1f0), region = 32 }
   0xc   : > { %s1470_s12 = smov (!%p191_p4, %s1256_s12), 1  ;;  %v211_v0 = vld [vmem:[%s1462_s1] sm:$0x7]  ;;  %vm383_vm0 = vcmask 1042432   ;;  %vm286_vm1 = vcmask 23552   ;;  %vm804_vm2 = vcmask 220160  }
   0xd   : > { %s1001_s16 = sshll.u32 %s1470_s12, 3  ;;  %1036 = vmatprep.subr.msk.mxu0 %vm383_vm0, %v211_v0  ;;  %1086 = vmatprep.subr.msk.mxu1 %vm383_vm0, %v211_v0  ;;  %v1348_v35 = vld [vmem:[%s1463_s2] ss:$0 sm:$0xff]  ;;  %s1002_s24 = sshll.u32 %s1470_s12, 8 }
   0xe   : > { %s198_s21 = scalar_lea.vmem %s1461_s0, %s1001_s16  ;;  %1037 = vmatpush3.msk.msra.mxu0 %vm383_vm0, %v211_v0  ;;  %1087 = vmatpush3.msk.msra.mxu1 %vm383_vm0, %v211_v0  ;;  %s1362_s27 = scalar_lea.vmem %s1464_s3, %s1002_s24 }
   0xf   : > { %v210_v1 = vld [vmem:[%s198_s21] sm:$0x77] }
  0x10   : > { %222 = vxpose.xlu0.b32.start.end [1/1] (short) %v210_v1, 128  ;;  %v220_v2 = vcombine.high %v210_v1, %v210_v1 }
  0x4d   : > { %254 = vxpose.xlu0.b32.start.end [1/1] (short) %v220_v2, 128 }
  0x8c   : > { %v238_v3 = vpop.trf.xlu0 }
  0x8d   : > { %1038 = vmatprep.mubr.msk.f32.mxu0 %vm286_vm1, %v238_v3 }
  0x90   : > { %v239_v4 = vpop.trf.xlu0 }
  0x91   : > { %1039 = vmatmul.mubr.msk.f32.vlgmr.msra.gmra.mxu0 %vm286_vm1, %v239_v4 }
  0x94   : > { %v240_v5 = vpop.trf.xlu0 }
  0x95   : > { %1041 = vmatprep.mubr.msk.f32.mxu0 %vm286_vm1, %v240_v5 }
  0x98   : > { %v241_v6 = vpop.trf.xlu0 }
  0x99   : > { %1042 = vmatmul.mubr.msk.f32.gmra.mxu0 %vm286_vm1, %v241_v6 }
  0x9c   : > { %v242_v7 = vpop.trf.xlu0 }
  0x9d   : > { %1044 = vmatprep.mubr.msk.f32.mxu0 %vm286_vm1, %v242_v7 }
  0xa0   : > { %v243_v8 = vpop.trf.xlu0 }
  0xa1   : > { %1045 = vmatmul.mubr.msk.f32.gmra.mxu0 %vm286_vm1, %v243_v8 }
  0xa4   : > { %v244_v9 = vpop.trf.xlu0 }
  0xa5   : > { %1047 = vmatprep.mubr.msk.f32.mxu0 %vm286_vm1, %v244_v9 }
  0xa8   : > { %v245_v10 = vpop.trf.xlu0 }
  0xa9   : > { %1048 = vmatmul.mubr.msk.f32.gmra.mxu0 %vm286_vm1, %v245_v10 }
  0xac   : > { %v246_v11 = vpop.trf.xlu0 }
  0xad   : > { %1050 = vmatprep.mubr.msk.f32.mxu0 %vm286_vm1, %v246_v11 }
  0xb0   : > { %v247_v12 = vpop.trf.xlu0 }
  0xb1   : > { %1051 = vmatmul.mubr.msk.f32.gmra.mxu0 %vm286_vm1, %v247_v12 }
  0xb4   : > { %v248_v13 = vpop.trf.xlu0 }
  0xb5   : > { %1053 = vmatprep.mubr.msk.f32.mxu0 %vm286_vm1, %v248_v13 }
  0xb8   : > { %v249_v14 = vpop.trf.xlu0 }
  0xb9   : > { %1054 = vmatmul.mubr.msk.f32.gmra.mxu0 %vm286_vm1, %v249_v14 }
  0xbc   : > { %v250_v15 = vpop.trf.xlu0 }
  0xbd   : > { %1056 = vmatprep.mubr.msk.f32.mxu0 %vm286_vm1, %v250_v15 }
  0xc0   : > { %v251_v16 = vpop.trf.xlu0 }
  0xc1   : > { %1057 = vmatmul.mubr.msk.f32.gmra.mxu0 %vm286_vm1, %v251_v16 }
  0xc4   : > { %v252_v17 = vpop.trf.xlu0 }
  0xc5   : > { %1059 = vmatprep.mubr.msk.f32.mxu0 %vm286_vm1, %v252_v17 }
  0xc8   : > { %v253_v18 = vpop.trf.xlu0 }
  0xc9   : > { %1060 = vmatmul.mubr.msk.f32.gmra.mxu0 %vm286_vm1, %v253_v18 }
  0xcc   : > { %v270_v19 = vpop.trf.xlu0 }
  0xcd   : > { %1062 = vmatprep.mubr.msk.f32.mxu1 %vm286_vm1, %v270_v19 }
  0xd0   : > { %v271_v20 = vpop.trf.xlu0 }
  0xd1   : > { %1063 = vmatmul.mubr.msk.f32.vlgmr.msra.gmra.mxu1 %vm286_vm1, %v271_v20 }
  0xd4   : > { %v272_v21 = vpop.trf.xlu0 }
  0xd5   : > { %1065 = vmatprep.mubr.msk.f32.mxu1 %vm286_vm1, %v272_v21 }
  0xd8   : > { %v273_v22 = vpop.trf.xlu0 }
  0xd9   : > { %1066 = vmatmul.mubr.msk.f32.gmra.mxu1 %vm286_vm1, %v273_v22 }
  0xdc   : > { %v274_v23 = vpop.trf.xlu0 }
  0xdd   : > { %1068 = vmatprep.mubr.msk.f32.mxu1 %vm286_vm1, %v274_v23 }
  0xe0   : > { %v275_v24 = vpop.trf.xlu0 }
  0xe1   : > { %1069 = vmatmul.mubr.msk.f32.gmra.mxu1 %vm286_vm1, %v275_v24 }
  0xe4   : > { %v276_v25 = vpop.trf.xlu0 }
  0xe5   : > { %1071 = vmatprep.mubr.msk.f32.mxu1 %vm286_vm1, %v276_v25 }
  0xe8   : > { %v277_v26 = vpop.trf.xlu0 }
  0xe9   : > { %1072 = vmatmul.mubr.msk.f32.gmra.mxu1 %vm286_vm1, %v277_v26 }
  0xec   : > { %v278_v27 = vpop.trf.xlu0 }
  0xed   : > { %1074 = vmatprep.mubr.msk.f32.mxu1 %vm286_vm1, %v278_v27 }
  0xf0   : > { %v279_v28 = vpop.trf.xlu0 }
  0xf1   : > { %1075 = vmatmul.mubr.msk.f32.gmra.mxu1 %vm286_vm1, %v279_v28 }
  0xf4   : > { %v280_v29 = vpop.trf.xlu0 }
  0xf5   : > { %1077 = vmatprep.mubr.msk.f32.mxu1 %vm286_vm1, %v280_v29 }
  0xf8   : > { %v281_v30 = vpop.trf.xlu0 }
  0xf9   : > { %1078 = vmatmul.mubr.msk.f32.gmra.mxu1 %vm286_vm1, %v281_v30 }
  0xfc   : > { %v282_v31 = vpop.trf.xlu0 }
  0xfd   : > { %1080 = vmatprep.mubr.msk.f32.mxu1 %vm286_vm1, %v282_v31 }
 0x100   : > { %v283_v32 = vpop.trf.xlu0 }
 0x101   : > { %1081 = vmatmul.mubr.msk.f32.gmra.mxu1 %vm286_vm1, %v283_v32 }
 0x104   : > { %v284_v33 = vpop.trf.xlu0 }
 0x105   : > { %1083 = vmatprep.mubr.msk.f32.mxu1 %vm286_vm1, %v284_v33 }
 0x108   : > { %v285_v34 = vpop.trf.xlu0 }
 0x109   : > { %1084 = vmatmul.mubr.msk.f32.gmra.mxu1 %vm286_vm1, %v285_v34 }
 0x151   : > { %v1040_v36 = vpop.f32.mrf.mxu0 }
 0x152   : > { %v459_v37 = vadd.f32 %v1040_v36, %v1348_v35 }
 0x153   : > { %v453_v38 = vpop.f32.mrf.mxu0 }
 0x154   : > { %v968_v39 = vmul.f32 -1.442695, %v459_v37  ;;  %v454_v40 = vadd.f32 %v1348_v35, %v453_v38 }
 0x156   : > { %1114 = vpow2.f32 %v968_v39  ;;  %v967_v41 = vmul.f32 -1.442695, %v454_v40 }
 0x158   : > { %1116 = vpow2.f32 %v967_v41 }
 0x159   : > { %v1043_v42 = vpop.f32.mrf.mxu0 }
 0x15a   : > { %v469_v43 = vadd.f32 %v1043_v42, %v1348_v35 }
 0x15b   : > { %v463_v44 = vpop.f32.mrf.mxu0 }
 0x15c   : > { %v970_v45 = vmul.f32 -1.442695, %v469_v43  ;;  %v464_v46 = vadd.f32 %v1348_v35, %v463_v44 }
 0x15e   : > { %1118 = vpow2.f32 %v970_v45  ;;  %v969_v47 = vmul.f32 -1.442695, %v464_v46 }
 0x160   : > { %1120 = vpow2.f32 %v969_v47 }
 0x161   : > { %v1046_v48 = vpop.f32.mrf.mxu0 }
 0x162   : > { %v479_v49 = vadd.f32 %v1046_v48, %v1348_v35 }
 0x163   : > { %v1115_v50 = vpop.eup %1114  ;;  %v473_v51 = vpop.f32.mrf.mxu0 }
 0x164   : > { %v709_v52 = vadd.f32 1.0, %v1115_v50  ;;  %v972_v53 = vmul.f32 -1.442695, %v479_v49  ;;  %v474_v54 = vadd.f32 %v1348_v35, %v473_v51 }
 0x165   : > { %v1117_v55 = vpop.eup %1116 }
 0x166   : > { %1122 = vrcp.f32 %v709_v52  ;;  %v708_v56 = vadd.f32 1.0, %v1117_v55  ;;  %v971_v57 = vmul.f32 -1.442695, %v474_v54 }
 0x167   : > { %1124 = vpow2.f32 %v972_v53 }
 0x168   : > { %1126 = vrcp.f32 %v708_v56 }
 0x169   : > { %1128 = vpow2.f32 %v971_v57  ;;  %v1049_v58 = vpop.f32.mrf.mxu0 }
 0x16a   : > { %v489_v59 = vadd.f32 %v1049_v58, %v1348_v35 }
 0x16b   : > { %v1119_v60 = vpop.eup %1118  ;;  %v483_v61 = vpop.f32.mrf.mxu0 }
 0x16c   : > { %v711_v62 = vadd.f32 1.0, %v1119_v60  ;;  %v974_v63 = vmul.f32 -1.442695, %v489_v59  ;;  %v484_v0 = vadd.f32 %v1348_v35, %v483_v61 }
 0x16d   : > { %v1121_v1 = vpop.eup %1120 }
 0x16e   : > { %1130 = vrcp.f32 %v711_v62  ;;  %v710_v2 = vadd.f32 1.0, %v1121_v1  ;;  %v973_v3 = vmul.f32 -1.442695, %v484_v0 }
 0x16f   : > { %1132 = vpow2.f32 %v974_v63 }
 0x170   : > { %1134 = vrcp.f32 %v710_v2 }
 0x171   : > { %1136 = vpow2.f32 %v973_v3  ;;  %v1052_v4 = vpop.f32.mrf.mxu0 }
 0x172   : > { %v499_v5 = vadd.f32 %v1052_v4, %v1348_v35 }
 0x173   : > { %v1123_v6 = vpop.eup %1122  ;;  %v493_v7 = vpop.f32.mrf.mxu0 }
 0x174   : > { %v1125_v8 = vpop.eup %1124  ;;  %806 = vst.msk [vmem:[%s1362_s27 + $0x8] sm:$0xff] %vm804_vm2, %v1123_v6  ;;  %v976_v9 = vmul.f32 -1.442695, %v499_v5  ;;  %v494_v10 = vadd.f32 %v1348_v35, %v493_v7 }
 0x175   : > { %v1127_v11 = vpop.eup %1126  ;;  %v713_v12 = vadd.f32 1.0, %v1125_v8 }
 0x176   : > { %v1129_v13 = vpop.eup %1128  ;;  %805 = vst.msk [vmem:[%s1362_s27] sm:$0xff] %vm804_vm2, %v1127_v11  ;;  %1138 = vpow2.f32 %v976_v9  ;;  %v975_v14 = vmul.f32 -1.442695, %v494_v10 }
 0x177   : > { %1140 = vrcp.f32 %v713_v12  ;;  %v712_v15 = vadd.f32 1.0, %v1129_v13 }
 0x178   : > { %1142 = vpow2.f32 %v975_v14 }
 0x179   : > { %1144 = vrcp.f32 %v712_v15  ;;  %v1055_v16 = vpop.f32.mrf.mxu0 }
 0x17a   : > { %v509_v17 = vadd.f32 %v1055_v16, %v1348_v35 }
 0x17b   : > { %v1131_v18 = vpop.eup %1130  ;;  %v503_v19 = vpop.f32.mrf.mxu0 }
 0x17c   : > { %v1133_v20 = vpop.eup %1132  ;;  %808 = vst.msk [vmem:[%s1362_s27 + $0x18] sm:$0xff] %vm804_vm2, %v1131_v18  ;;  %v978_v21 = vmul.f32 -1.442695, %v509_v17  ;;  %v504_v22 = vadd.f32 %v1348_v35, %v503_v19 }
 0x17d   : > { %v1135_v23 = vpop.eup %1134  ;;  %v715_v24 = vadd.f32 1.0, %v1133_v20 }
 0x17e   : > { %v1137_v25 = vpop.eup %1136  ;;  %807 = vst.msk [vmem:[%s1362_s27 + $0x10] sm:$0xff] %vm804_vm2, %v1135_v23  ;;  %1146 = vpow2.f32 %v978_v21  ;;  %v977_v26 = vmul.f32 -1.442695, %v504_v22 }
 0x17f   : > { %1148 = vrcp.f32 %v715_v24  ;;  %v714_v27 = vadd.f32 1.0, %v1137_v25 }
 0x180   : > { %1150 = vpow2.f32 %v977_v26 }
 0x181   : > { %1152 = vrcp.f32 %v714_v27  ;;  %v1058_v28 = vpop.f32.mrf.mxu0 }
 0x182   : > { %v519_v29 = vadd.f32 %v1058_v28, %v1348_v35 }
 0x183   : > { %v1139_v30 = vpop.eup %1138  ;;  %v513_v31 = vpop.f32.mrf.mxu0 }
 0x184   : > { %v1141_v32 = vpop.eup %1140  ;;  %v717_v33 = vadd.f32 1.0, %v1139_v30  ;;  %v980_v34 = vmul.f32 -1.442695, %v519_v29  ;;  %v514_v36 = vadd.f32 %v1348_v35, %v513_v31 }
 0x185   : > { %v1143_v37 = vpop.eup %1142  ;;  %810 = vst.msk [vmem:[%s1362_s27 + $0x28] sm:$0xff] %vm804_vm2, %v1141_v32 }
 0x186   : > { %v1145_v38 = vpop.eup %1144  ;;  %1154 = vrcp.f32 %v717_v33  ;;  %v716_v39 = vadd.f32 1.0, %v1143_v37  ;;  %v979_v40 = vmul.f32 -1.442695, %v514_v36 }
 0x187   : > { %809 = vst.msk [vmem:[%s1362_s27 + $0x20] sm:$0xff] %vm804_vm2, %v1145_v38  ;;  %1156 = vpow2.f32 %v980_v34 }
 0x188   : > { %1158 = vrcp.f32 %v716_v39 }
 0x189   : > { %1160 = vpow2.f32 %v979_v40  ;;  %v1061_v41 = vpop.f32.mrf.mxu0 }
 0x18a   : > { %v529_v42 = vadd.f32 %v1061_v41, %v1348_v35 }
 0x18b   : > { %v1147_v43 = vpop.eup %1146  ;;  %v523_v44 = vpop.f32.mrf.mxu0 }
 0x18c   : > { %v1149_v45 = vpop.eup %1148  ;;  %v719_v46 = vadd.f32 1.0, %v1147_v43  ;;  %v982_v47 = vmul.f32 -1.442695, %v529_v42  ;;  %v524_v48 = vadd.f32 %v1348_v35, %v523_v44 }
 0x18d   : > { %v1151_v49 = vpop.eup %1150  ;;  %812 = vst.msk [vmem:[%s1362_s27 + $0x38] sm:$0xff] %vm804_vm2, %v1149_v45 }
 0x18e   : > { %v1153_v50 = vpop.eup %1152  ;;  %1162 = vrcp.f32 %v719_v46  ;;  %v718_v51 = vadd.f32 1.0, %v1151_v49  ;;  %v981_v52 = vmul.f32 -1.442695, %v524_v48 }
 0x18f   : > { %811 = vst.msk [vmem:[%s1362_s27 + $0x30] sm:$0xff] %vm804_vm2, %v1153_v50  ;;  %1164 = vpow2.f32 %v982_v47 }
 0x190   : > { %1166 = vrcp.f32 %v718_v51 }
 0x191   : > { %1168 = vpow2.f32 %v981_v52  ;;  %v1064_v53 = vpop.f32.mrf.mxu1 }
 0x192   : > { %v539_v54 = vadd.f32 %v1064_v53, %v1348_v35 }
 0x193   : > { %v1155_v55 = vpop.eup %1154  ;;  %v533_v56 = vpop.f32.mrf.mxu1 }
 0x194   : > { %v1157_v57 = vpop.eup %1156  ;;  %814 = vst.msk [vmem:[%s1362_s27 + $0x48] sm:$0xff] %vm804_vm2, %v1155_v55  ;;  %v984_v58 = vmul.f32 -1.442695, %v539_v54  ;;  %v534_v59 = vadd.f32 %v1348_v35, %v533_v56 }
 0x195   : > { %v1159_v60 = vpop.eup %1158  ;;  %v721_v61 = vadd.f32 1.0, %v1157_v57 }
 0x196   : > { %v1161_v62 = vpop.eup %1160  ;;  %813 = vst.msk [vmem:[%s1362_s27 + $0x40] sm:$0xff] %vm804_vm2, %v1159_v60  ;;  %1170 = vpow2.f32 %v984_v58  ;;  %v983_v63 = vmul.f32 -1.442695, %v534_v59 }
 0x197   : > { %1172 = vrcp.f32 %v721_v61  ;;  %v720_v0 = vadd.f32 1.0, %v1161_v62 }
 0x198   : > { %1174 = vpow2.f32 %v983_v63 }
 0x199   : > { %1176 = vrcp.f32 %v720_v0  ;;  %v1067_v1 = vpop.f32.mrf.mxu1 }
 0x19a   : > { %v549_v2 = vadd.f32 %v1067_v1, %v1348_v35 }
 0x19b   : > { %v1163_v3 = vpop.eup %1162  ;;  %v543_v4 = vpop.f32.mrf.mxu1 }
 0x19c   : > { %v1165_v5 = vpop.eup %1164  ;;  %816 = vst.msk [vmem:[%s1362_s27 + $0x58] sm:$0xff] %vm804_vm2, %v1163_v3  ;;  %v986_v6 = vmul.f32 -1.442695, %v549_v2  ;;  %v544_v7 = vadd.f32 %v1348_v35, %v543_v4 }
 0x19d   : > { %v1167_v8 = vpop.eup %1166  ;;  %v723_v9 = vadd.f32 1.0, %v1165_v5 }
 0x19e   : > { %v1169_v10 = vpop.eup %1168  ;;  %815 = vst.msk [vmem:[%s1362_s27 + $0x50] sm:$0xff] %vm804_vm2, %v1167_v8  ;;  %1178 = vpow2.f32 %v986_v6  ;;  %v985_v11 = vmul.f32 -1.442695, %v544_v7 }
 0x19f   : > { %1180 = vrcp.f32 %v723_v9  ;;  %v722_v12 = vadd.f32 1.0, %v1169_v10 }
 0x1a0   : > { %1182 = vpow2.f32 %v985_v11 }
 0x1a1   : > { %1184 = vrcp.f32 %v722_v12  ;;  %v1070_v13 = vpop.f32.mrf.mxu1 }
 0x1a2   : > { %v559_v14 = vadd.f32 %v1070_v13, %v1348_v35 }
 0x1a3   : > { %v1171_v15 = vpop.eup %1170  ;;  %v553_v16 = vpop.f32.mrf.mxu1 }
 0x1a4   : > { %v1173_v17 = vpop.eup %1172  ;;  %v725_v18 = vadd.f32 1.0, %v1171_v15  ;;  %v988_v19 = vmul.f32 -1.442695, %v559_v14  ;;  %v554_v20 = vadd.f32 %v1348_v35, %v553_v16 }
 0x1a5   : > { %v1175_v21 = vpop.eup %1174  ;;  %818 = vst.msk [vmem:[%s1362_s27 + $0x68] sm:$0xff] %vm804_vm2, %v1173_v17 }
 0x1a6   : > { %v1177_v22 = vpop.eup %1176  ;;  %1186 = vrcp.f32 %v725_v18  ;;  %v724_v23 = vadd.f32 1.0, %v1175_v21  ;;  %v987_v24 = vmul.f32 -1.442695, %v554_v20 }
 0x1a7   : > { %817 = vst.msk [vmem:[%s1362_s27 + $0x60] sm:$0xff] %vm804_vm2, %v1177_v22  ;;  %1188 = vpow2.f32 %v988_v19 }
 0x1a8   : > { %1190 = vrcp.f32 %v724_v23 }
 0x1a9   : > { %1192 = vpow2.f32 %v987_v24  ;;  %v1073_v25 = vpop.f32.mrf.mxu1 }
 0x1aa   : > { %v569_v26 = vadd.f32 %v1073_v25, %v1348_v35 }
 0x1ab   : > { %v1179_v27 = vpop.eup %1178  ;;  %v563_v28 = vpop.f32.mrf.mxu1 }
 0x1ac   : > { %v1181_v29 = vpop.eup %1180  ;;  %v727_v30 = vadd.f32 1.0, %v1179_v27  ;;  %v990_v31 = vmul.f32 -1.442695, %v569_v26  ;;  %v564_v32 = vadd.f32 %v1348_v35, %v563_v28 }
 0x1ad   : > { %v1183_v33 = vpop.eup %1182  ;;  %820 = vst.msk [vmem:[%s1362_s27 + $0x78] sm:$0xff] %vm804_vm2, %v1181_v29 }
 0x1ae   : > { %v1185_v34 = vpop.eup %1184  ;;  %1194 = vrcp.f32 %v727_v30  ;;  %v726_v36 = vadd.f32 1.0, %v1183_v33  ;;  %v989_v37 = vmul.f32 -1.442695, %v564_v32 }
 0x1af   : > { %819 = vst.msk [vmem:[%s1362_s27 + $0x70] sm:$0xff] %vm804_vm2, %v1185_v34  ;;  %1196 = vpow2.f32 %v990_v31 }
 0x1b0   : > { %1198 = vrcp.f32 %v726_v36 }
 0x1b1   : > { %1200 = vpow2.f32 %v989_v37  ;;  %v1076_v38 = vpop.f32.mrf.mxu1 }
 0x1b2   : > { %v579_v39 = vadd.f32 %v1076_v38, %v1348_v35 }
 0x1b3   : > { %v1187_v40 = vpop.eup %1186  ;;  %v573_v41 = vpop.f32.mrf.mxu1 }
 0x1b4   : > { %v1189_v42 = vpop.eup %1188  ;;  %822 = vst.msk [vmem:[%s1362_s27 + $0x88] sm:$0xff] %vm804_vm2, %v1187_v40  ;;  %v992_v43 = vmul.f32 -1.442695, %v579_v39  ;;  %v574_v44 = vadd.f32 %v1348_v35, %v573_v41 }
 0x1b5   : > { %v1191_v45 = vpop.eup %1190  ;;  %v729_v46 = vadd.f32 1.0, %v1189_v42 }
 0x1b6   : > { %v1193_v47 = vpop.eup %1192  ;;  %821 = vst.msk [vmem:[%s1362_s27 + $0x80] sm:$0xff] %vm804_vm2, %v1191_v45  ;;  %1202 = vpow2.f32 %v992_v43  ;;  %v991_v48 = vmul.f32 -1.442695, %v574_v44 }
 0x1b7   : > { %1204 = vrcp.f32 %v729_v46  ;;  %v728_v49 = vadd.f32 1.0, %v1193_v47 }
 0x1b8   : > { %1206 = vpow2.f32 %v991_v48 }
 0x1b9   : > { %1208 = vrcp.f32 %v728_v49  ;;  %v1079_v50 = vpop.f32.mrf.mxu1 }
 0x1ba   : > { %v589_v51 = vadd.f32 %v1079_v50, %v1348_v35 }
 0x1bb   : > { %v1195_v52 = vpop.eup %1194  ;;  %v583_v53 = vpop.f32.mrf.mxu1 }
 0x1bc   : > { %v1197_v54 = vpop.eup %1196  ;;  %824 = vst.msk [vmem:[%s1362_s27 + $0x98] sm:$0xff] %vm804_vm2, %v1195_v52  ;;  %v994_v55 = vmul.f32 -1.442695, %v589_v51  ;;  %v584_v56 = vadd.f32 %v1348_v35, %v583_v53 }
 0x1bd   : > { %v1199_v57 = vpop.eup %1198  ;;  %v731_v58 = vadd.f32 1.0, %v1197_v54 }
 0x1be   : > { %v1201_v59 = vpop.eup %1200  ;;  %823 = vst.msk [vmem:[%s1362_s27 + $0x90] sm:$0xff] %vm804_vm2, %v1199_v57  ;;  %1210 = vpow2.f32 %v994_v55  ;;  %v993_v60 = vmul.f32 -1.442695, %v584_v56 }
 0x1bf   : > { %1212 = vrcp.f32 %v731_v58  ;;  %v730_v61 = vadd.f32 1.0, %v1201_v59 }
 0x1c0   : > { %1214 = vpow2.f32 %v993_v60 }
 0x1c1   : > { %1216 = vrcp.f32 %v730_v61  ;;  %v1082_v62 = vpop.f32.mrf.mxu1 }
 0x1c2   : > { %v599_v63 = vadd.f32 %v1082_v62, %v1348_v35 }
 0x1c3   : > { %v1203_v0 = vpop.eup %1202  ;;  %v593_v1 = vpop.f32.mrf.mxu1 }
 0x1c4   : > { %v1205_v2 = vpop.eup %1204  ;;  %v733_v3 = vadd.f32 1.0, %v1203_v0  ;;  %v996_v4 = vmul.f32 -1.442695, %v599_v63  ;;  %v594_v5 = vadd.f32 %v1348_v35, %v593_v1 }
 0x1c5   : > { %v1207_v6 = vpop.eup %1206  ;;  %826 = vst.msk [vmem:[%s1362_s27 + $0xa8] sm:$0xff] %vm804_vm2, %v1205_v2 }
 0x1c6   : > { %v1209_v7 = vpop.eup %1208  ;;  %1218 = vrcp.f32 %v733_v3  ;;  %v732_v8 = vadd.f32 1.0, %v1207_v6  ;;  %v995_v9 = vmul.f32 -1.442695, %v594_v5 }
 0x1c7   : > { %825 = vst.msk [vmem:[%s1362_s27 + $0xa0] sm:$0xff] %vm804_vm2, %v1209_v7  ;;  %1220 = vpow2.f32 %v996_v4 }
 0x1c8   : > { %1222 = vrcp.f32 %v732_v8 }
 0x1c9   : > { %1224 = vpow2.f32 %v995_v9  ;;  %v1085_v10 = vpop.f32.mrf.mxu1 }
 0x1ca   : > { %v609_v11 = vadd.f32 %v1085_v10, %v1348_v35 }
 0x1cb   : > { %v1211_v12 = vpop.eup %1210  ;;  %v603_v13 = vpop.f32.mrf.mxu1 }
 0x1cc   : > { %v1213_v14 = vpop.eup %1212  ;;  %v735_v15 = vadd.f32 1.0, %v1211_v12  ;;  %v998_v16 = vmul.f32 -1.442695, %v609_v11  ;;  %v604_v17 = vadd.f32 %v1348_v35, %v603_v13 }
 0x1cd   : > { %v1215_v18 = vpop.eup %1214  ;;  %828 = vst.msk [vmem:[%s1362_s27 + $0xb8] sm:$0xff] %vm804_vm2, %v1213_v14 }
 0x1ce   : > { %v1217_v19 = vpop.eup %1216  ;;  %1226 = vrcp.f32 %v735_v15  ;;  %v734_v20 = vadd.f32 1.0, %v1215_v18  ;;  %v997_v21 = vmul.f32 -1.442695, %v604_v17 }
 0x1cf   : > { %827 = vst.msk [vmem:[%s1362_s27 + $0xb0] sm:$0xff] %vm804_vm2, %v1217_v19  ;;  %1228 = vpow2.f32 %v998_v16 }
 0x1d0   : > { %1230 = vrcp.f32 %v734_v20 }
 0x1d1   : > { %1232 = vpow2.f32 %v997_v21 }
 0x1d3   : > { %v1219_v22 = vpop.eup %1218 }
 0x1d4   : > { %v1221_v23 = vpop.eup %1220  ;;  %830 = vst.msk [vmem:[%s1362_s27 + $0xc8] sm:$0xff] %vm804_vm2, %v1219_v22 }
 0x1d5   : > { %v1223_v35 = vpop.eup %1222  ;;  %v737_v24 = vadd.f32 1.0, %v1221_v23 }
 0x1d6   : > { %v1225_v25 = vpop.eup %1224  ;;  %829 = vst.msk [vmem:[%s1362_s27 + $0xc0] sm:$0xff] %vm804_vm2, %v1223_v35 }
 0x1d7   : > { %1234 = vrcp.f32 %v737_v24  ;;  %v736_v26 = vadd.f32 1.0, %v1225_v25 }
 0x1d9   : > { %1236 = vrcp.f32 %v736_v26 }
 0x1db   : > { %v1227_v27 = vpop.eup %1226 }
 0x1dc   : > { %v1229_v28 = vpop.eup %1228  ;;  %832 = vst.msk [vmem:[%s1362_s27 + $0xd8] sm:$0xff] %vm804_vm2, %v1227_v27 }
 0x1dd   : > { %v1231_v29 = vpop.eup %1230  ;;  %v739_v30 = vadd.f32 1.0, %v1229_v28 }
 0x1de   : > { %v1233_v31 = vpop.eup %1232  ;;  %831 = vst.msk [vmem:[%s1362_s27 + $0xd0] sm:$0xff] %vm804_vm2, %v1231_v29 }
 0x1df   : > { %1238 = vrcp.f32 %v739_v30  ;;  %v738_v32 = vadd.f32 1.0, %v1233_v31 }
 0x1e1   : > { %1240 = vrcp.f32 %v738_v32 }
 0x1e4   : > { %v1235_v33 = vpop.eup %1234 }
 0x1e5   : > { %834 = vst.msk [vmem:[%s1362_s27 + $0xe8] sm:$0xff] %vm804_vm2, %v1235_v33 }
 0x1e6   : > { %v1237_v34 = vpop.eup %1236 }
 0x1e7   : > { %833 = vst.msk [vmem:[%s1362_s27 + $0xe0] sm:$0xff] %vm804_vm2, %v1237_v34 }
 0x1ec   : > { %v1239_v36 = vpop.eup %1238 }
 0x1ed   : > { %836 = vst.msk [vmem:[%s1362_s27 + $0xf8] sm:$0xff] %vm804_vm2, %v1239_v36 }
 0x1ee   : > { %v1241_v37 = vpop.eup %1240 }
 0x1ef   : > { %835 = vst.msk [vmem:[%s1362_s27 + $0xf0] sm:$0xff] %vm804_vm2, %v1241_v37 }
 0x1f0 PF: > { %s13_s14 = sadd.s32 1, %s1264_s14   ;;  %s1465_s12 = smov %s1260_s13 }
 0x1f1   : > { %p10_p5 = scmp.ge.s32.totalorder %s13_s14, 4   ;;  %s1466_s13 = smov %s1468_s15 }
 0x1f3   :  { %12 = sbr.rel (!%p10_p5) target bundleno = 2 (0x2), region = 62 }

// kernel: tpu_custom_call.1
= control target key start
LH: loop header
LB: loop body
LE: loop exit
PB: predicated region body
PF: predicated region fallthrough
CT: control target
= control target key end

     0   :  { %vm279_vm0 = vcmask 1042432   ;;  %vm86_vm1 = vcmask 23552   ;;  %vm1052_vm2 = vcmask 220160   ;;  %s2288_s1 = inlined_call_operand.vmem [shape: f32[3,27], index: 1, kind: input, shape index: {}]   ;;  %s2289_s0 = inlined_call_operand.vmem [shape: f32[512,3], index: 0, kind: input, shape index: {}]   ;;  %s2290_s2 = inlined_call_operand.vmem [shape: f32[1,27], index: 2, kind: input, shape index: {}]   ;;  %s2291_s3 = inlined_call_operand.vmem [shape: f32[512,27], index: 3, kind: output, shape index: {}]  }
   0x1   :  { %v78_v0 = vld [vmem:[%s2288_s1] sm:$0x7]  ;;  %v15_v3 = vld [vmem:[%s2289_s0 + $0x8] sm:$0xff]  ;;  %v16_v5 = vld [vmem:[%s2289_s0 + $0x10] sm:$0xff] }
   0x2   :  { %v14_v1 = vld [vmem:[%s2289_s0] sm:$0xff]  ;;  %1316 = vmatprep.subr.msk.mxu0 %vm279_vm0, %v78_v0  ;;  %1414 = vmatprep.subr.msk.mxu1 %vm279_vm0, %v78_v0  ;;  %v47_v4 = vld [vmem:[%s2289_s0 + $0x108] sm:$0xff]  ;;  %v48_v6 = vld [vmem:[%s2289_s0 + $0x110] sm:$0xff] }
   0x3   :  { %v46_v2 = vld [vmem:[%s2289_s0 + $0x100] sm:$0xff]  ;;  %1317 = vmatpush3.msk.msra.mxu0 %vm279_vm0, %v78_v0  ;;  %1415 = vmatpush3.msk.msra.mxu1 %vm279_vm0, %v78_v0  ;;  %v17_v7 = vld [vmem:[%s2289_s0 + $0x18] sm:$0xff]  ;;  %v19_v11 = vld [vmem:[%s2289_s0 + $0x28] sm:$0xff] }
   0x4   :  { %1318 = vmatprep.mubr.msk.f32.mxu0 %vm86_vm1, %v14_v1  ;;  %1366 = vmatprep.mubr.msk.f32.mxu1 %vm86_vm1, %v46_v2  ;;  %v49_v8 = vld [vmem:[%s2289_s0 + $0x118] sm:$0xff]  ;;  %v18_v9 = vld [vmem:[%s2289_s0 + $0x20] sm:$0xff]  ;;  %v51_v12 = vld [vmem:[%s2289_s0 + $0x128] sm:$0xff] }
   0x5   :  { %1319 = vmatmul.mubr.msk.f32.vlgmr.msra.gmra.mxu0 %vm86_vm1, %v15_v3  ;;  %1367 = vmatmul.mubr.msk.f32.vlgmr.msra.gmra.mxu1 %vm86_vm1, %v47_v4  ;;  %v50_v10 = vld [vmem:[%s2289_s0 + $0x120] sm:$0xff]  ;;  %v20_v13 = vld [vmem:[%s2289_s0 + $0x30] sm:$0xff]  ;;  %v21_v15 = vld [vmem:[%s2289_s0 + $0x38] sm:$0xff] }
   0x6   :  { %1321 = vmatprep.mubr.msk.f32.mxu0 %vm86_vm1, %v16_v5  ;;  %1369 = vmatprep.mubr.msk.f32.mxu1 %vm86_vm1, %v48_v6  ;;  %v52_v14 = vld [vmem:[%s2289_s0 + $0x130] sm:$0xff]  ;;  %v53_v16 = vld [vmem:[%s2289_s0 + $0x138] sm:$0xff]  ;;  %v22_v17 = vld [vmem:[%s2289_s0 + $0x40] sm:$0xff] }
   0x7   :  { %v54_v18 = vld [vmem:[%s2289_s0 + $0x140] sm:$0xff]  ;;  %v23_v19 = vld [vmem:[%s2289_s0 + $0x48] sm:$0xff]  ;;  %v24_v21 = vld [vmem:[%s2289_s0 + $0x50] sm:$0xff] }
   0x8   :  { %v55_v20 = vld [vmem:[%s2289_s0 + $0x148] sm:$0xff]  ;;  %v56_v22 = vld [vmem:[%s2289_s0 + $0x150] sm:$0xff]  ;;  %v25_v23 = vld [vmem:[%s2289_s0 + $0x58] sm:$0xff] }
   0x9   :  { %1322 = vmatmul.mubr.msk.f32.gmra.mxu0 %vm86_vm1, %v17_v7  ;;  %1370 = vmatmul.mubr.msk.f32.gmra.mxu1 %vm86_vm1, %v49_v8  ;;  %v57_v24 = vld [vmem:[%s2289_s0 + $0x158] sm:$0xff]  ;;  %v26_v25 = vld [vmem:[%s2289_s0 + $0x60] sm:$0xff]  ;;  %v27_v27 = vld [vmem:[%s2289_s0 + $0x68] sm:$0xff] }
   0xa   :  { %1324 = vmatprep.mubr.msk.f32.mxu0 %vm86_vm1, %v18_v9  ;;  %1372 = vmatprep.mubr.msk.f32.mxu1 %vm86_vm1, %v50_v10  ;;  %v58_v26 = vld [vmem:[%s2289_s0 + $0x160] sm:$0xff]  ;;  %v59_v28 = vld [vmem:[%s2289_s0 + $0x168] sm:$0xff]  ;;  %v28_v29 = vld [vmem:[%s2289_s0 + $0x70] sm:$0xff] }
   0xb   :  { %v60_v30 = vld [vmem:[%s2289_s0 + $0x170] sm:$0xff]  ;;  %v29_v31 = vld [vmem:[%s2289_s0 + $0x78] sm:$0xff]  ;;  %v30_v33 = vld [vmem:[%s2289_s0 + $0x80] sm:$0xff] }
   0xc   :  { %v61_v32 = vld [vmem:[%s2289_s0 + $0x178] sm:$0xff]  ;;  %v62_v34 = vld [vmem:[%s2289_s0 + $0x180] sm:$0xff]  ;;  %v31_v35 = vld [vmem:[%s2289_s0 + $0x88] sm:$0xff] }
   0xd   :  { %1325 = vmatmul.mubr.msk.f32.gmra.mxu0 %vm86_vm1, %v19_v11  ;;  %1373 = vmatmul.mubr.msk.f32.gmra.mxu1 %vm86_vm1, %v51_v12  ;;  %v63_v36 = vld [vmem:[%s2289_s0 + $0x188] sm:$0xff]  ;;  %v32_v37 = vld [vmem:[%s2289_s0 + $0x90] sm:$0xff]  ;;  %v33_v39 = vld [vmem:[%s2289_s0 + $0x98] sm:$0xff] }
   0xe   :  { %1327 = vmatprep.mubr.msk.f32.mxu0 %vm86_vm1, %v20_v13  ;;  %1375 = vmatprep.mubr.msk.f32.mxu1 %vm86_vm1, %v52_v14  ;;  %v64_v38 = vld [vmem:[%s2289_s0 + $0x190] sm:$0xff]  ;;  %v65_v40 = vld [vmem:[%s2289_s0 + $0x198] sm:$0xff]  ;;  %v34_v41 = vld [vmem:[%s2289_s0 + $0xa0] sm:$0xff] }
   0xf   :  { %v66_v42 = vld [vmem:[%s2289_s0 + $0x1a0] sm:$0xff]  ;;  %v35_v43 = vld [vmem:[%s2289_s0 + $0xa8] sm:$0xff]  ;;  %v36_v45 = vld [vmem:[%s2289_s0 + $0xb0] sm:$0xff] }
  0x10   :  { %v67_v44 = vld [vmem:[%s2289_s0 + $0x1a8] sm:$0xff]  ;;  %v68_v46 = vld [vmem:[%s2289_s0 + $0x1b0] sm:$0xff]  ;;  %v37_v47 = vld [vmem:[%s2289_s0 + $0xb8] sm:$0xff] }
  0x11   :  { %1328 = vmatmul.mubr.msk.f32.gmra.mxu0 %vm86_vm1, %v21_v15  ;;  %1376 = vmatmul.mubr.msk.f32.gmra.mxu1 %vm86_vm1, %v53_v16  ;;  %v69_v48 = vld [vmem:[%s2289_s0 + $0x1b8] sm:$0xff]  ;;  %v38_v49 = vld [vmem:[%s2289_s0 + $0xc0] sm:$0xff]  ;;  %v39_v51 = vld [vmem:[%s2289_s0 + $0xc8] sm:$0xff] }
  0x12   :  { %1330 = vmatprep.mubr.msk.f32.mxu0 %vm86_vm1, %v22_v17  ;;  %1378 = vmatprep.mubr.msk.f32.mxu1 %vm86_vm1, %v54_v18  ;;  %v70_v50 = vld [vmem:[%s2289_s0 + $0x1c0] sm:$0xff]  ;;  %v71_v52 = vld [vmem:[%s2289_s0 + $0x1c8] sm:$0xff]  ;;  %v40_v53 = vld [vmem:[%s2289_s0 + $0xd0] sm:$0xff] }
  0x13   :  { %v72_v54 = vld [vmem:[%s2289_s0 + $0x1d0] sm:$0xff]  ;;  %v41_v55 = vld [vmem:[%s2289_s0 + $0xd8] sm:$0xff]  ;;  %v42_v57 = vld [vmem:[%s2289_s0 + $0xe0] sm:$0xff] }
  0x14   :  { %v73_v56 = vld [vmem:[%s2289_s0 + $0x1d8] sm:$0xff]  ;;  %v74_v58 = vld [vmem:[%s2289_s0 + $0x1e0] sm:$0xff]  ;;  %v43_v59 = vld [vmem:[%s2289_s0 + $0xe8] sm:$0xff] }
  0x15   :  { %1331 = vmatmul.mubr.msk.f32.gmra.mxu0 %vm86_vm1, %v23_v19  ;;  %1379 = vmatmul.mubr.msk.f32.gmra.mxu1 %vm86_vm1, %v55_v20  ;;  %v75_v60 = vld [vmem:[%s2289_s0 + $0x1e8] sm:$0xff]  ;;  %v44_v61 = vld [vmem:[%s2289_s0 + $0xf0] sm:$0xff]  ;;  %v45_v63 = vld [vmem:[%s2289_s0 + $0xf8] sm:$0xff] }
  0x16   :  { %1333 = vmatprep.mubr.msk.f32.mxu0 %vm86_vm1, %v24_v21  ;;  %1381 = vmatprep.mubr.msk.f32.mxu1 %vm86_vm1, %v56_v22  ;;  %v76_v62 = vld [vmem:[%s2289_s0 + $0x1f0] sm:$0xff]  ;;  %v77_v0 = vld [vmem:[%s2289_s0 + $0x1f8] sm:$0xff]  ;;  %v1954_v1 = vld [vmem:[%s2290_s2] ss:$0 sm:$0xff] }
  0x19   :  { %1334 = vmatmul.mubr.msk.f32.gmra.mxu0 %vm86_vm1, %v25_v23  ;;  %1382 = vmatmul.mubr.msk.f32.gmra.mxu1 %vm86_vm1, %v57_v24 }
  0x1a   :  { %1336 = vmatprep.mubr.msk.f32.mxu0 %vm86_vm1, %v26_v25  ;;  %1384 = vmatprep.mubr.msk.f32.mxu1 %vm86_vm1, %v58_v26 }
  0x1d   :  { %1337 = vmatmul.mubr.msk.f32.gmra.mxu0 %vm86_vm1, %v27_v27  ;;  %1385 = vmatmul.mubr.msk.f32.gmra.mxu1 %vm86_vm1, %v59_v28 }
  0x1e   :  { %1339 = vmatprep.mubr.msk.f32.mxu0 %vm86_vm1, %v28_v29  ;;  %1387 = vmatprep.mubr.msk.f32.mxu1 %vm86_vm1, %v60_v30 }
  0x21   :  { %1340 = vmatmul.mubr.msk.f32.gmra.mxu0 %vm86_vm1, %v29_v31  ;;  %1388 = vmatmul.mubr.msk.f32.gmra.mxu1 %vm86_vm1, %v61_v32 }
  0x22   :  { %1342 = vmatprep.mubr.msk.f32.mxu0 %vm86_vm1, %v30_v33  ;;  %1390 = vmatprep.mubr.msk.f32.mxu1 %vm86_vm1, %v62_v34 }
  0x25   :  { %1343 = vmatmul.mubr.msk.f32.gmra.mxu0 %vm86_vm1, %v31_v35  ;;  %1391 = vmatmul.mubr.msk.f32.gmra.mxu1 %vm86_vm1, %v63_v36 }
  0x26   :  { %1345 = vmatprep.mubr.msk.f32.mxu0 %vm86_vm1, %v32_v37  ;;  %1393 = vmatprep.mubr.msk.f32.mxu1 %vm86_vm1, %v64_v38 }
  0x29   :  { %1346 = vmatmul.mubr.msk.f32.gmra.mxu0 %vm86_vm1, %v33_v39  ;;  %1394 = vmatmul.mubr.msk.f32.gmra.mxu1 %vm86_vm1, %v65_v40 }
  0x2a   :  { %1348 = vmatprep.mubr.msk.f32.mxu0 %vm86_vm1, %v34_v41  ;;  %1396 = vmatprep.mubr.msk.f32.mxu1 %vm86_vm1, %v66_v42 }
  0x2d   :  { %1349 = vmatmul.mubr.msk.f32.gmra.mxu0 %vm86_vm1, %v35_v43  ;;  %1397 = vmatmul.mubr.msk.f32.gmra.mxu1 %vm86_vm1, %v67_v44 }
  0x2e   :  { %1351 = vmatprep.mubr.msk.f32.mxu0 %vm86_vm1, %v36_v45  ;;  %1399 = vmatprep.mubr.msk.f32.mxu1 %vm86_vm1, %v68_v46 }
  0x31   :  { %1352 = vmatmul.mubr.msk.f32.gmra.mxu0 %vm86_vm1, %v37_v47  ;;  %1400 = vmatmul.mubr.msk.f32.gmra.mxu1 %vm86_vm1, %v69_v48 }
  0x32   :  { %1354 = vmatprep.mubr.msk.f32.mxu0 %vm86_vm1, %v38_v49  ;;  %1402 = vmatprep.mubr.msk.f32.mxu1 %vm86_vm1, %v70_v50 }
  0x35   :  { %1355 = vmatmul.mubr.msk.f32.gmra.mxu0 %vm86_vm1, %v39_v51  ;;  %1403 = vmatmul.mubr.msk.f32.gmra.mxu1 %vm86_vm1, %v71_v52 }
  0x36   :  { %1357 = vmatprep.mubr.msk.f32.mxu0 %vm86_vm1, %v40_v53  ;;  %1405 = vmatprep.mubr.msk.f32.mxu1 %vm86_vm1, %v72_v54 }
  0x39   :  { %1358 = vmatmul.mubr.msk.f32.gmra.mxu0 %vm86_vm1, %v41_v55  ;;  %1406 = vmatmul.mubr.msk.f32.gmra.mxu1 %vm86_vm1, %v73_v56 }
  0x3a   :  { %1360 = vmatprep.mubr.msk.f32.mxu0 %vm86_vm1, %v42_v57  ;;  %1408 = vmatprep.mubr.msk.f32.mxu1 %vm86_vm1, %v74_v58 }
  0x3d   :  { %1361 = vmatmul.mubr.msk.f32.gmra.mxu0 %vm86_vm1, %v43_v59  ;;  %1409 = vmatmul.mubr.msk.f32.gmra.mxu1 %vm86_vm1, %v75_v60 }
  0x3e   :  { %1363 = vmatprep.mubr.msk.f32.mxu0 %vm86_vm1, %v44_v61  ;;  %1411 = vmatprep.mubr.msk.f32.mxu1 %vm86_vm1, %v76_v62 }
  0x41   :  { %1364 = vmatmul.mubr.msk.f32.gmra.mxu0 %vm86_vm1, %v45_v63  ;;  %1412 = vmatmul.mubr.msk.f32.gmra.mxu1 %vm86_vm1, %v77_v0 }
  0xc5   :  { %v1320_v2 = vpop.f32.mrf.mxu0  ;;  %v1368_v3 = vpop.f32.mrf.mxu1 }
  0xc6   :  { %v355_v4 = vadd.f32 %v1320_v2, %v1954_v1  ;;  %v515_v5 = vadd.f32 %v1368_v3, %v1954_v1 }
  0xc7   :  { %v349_v6 = vpop.f32.mrf.mxu0  ;;  %v509_v7 = vpop.f32.mrf.mxu1 }
  0xc8   :  { %v1188_v8 = vmul.f32 -1.442695, %v355_v4  ;;  %v1220_v9 = vmul.f32 -1.442695, %v515_v5  ;;  %v350_v10 = vadd.f32 %v1954_v1, %v349_v6  ;;  %v510_v11 = vadd.f32 %v1954_v1, %v509_v7 }
  0xc9   :  { %v1323_v12 = vpop.f32.mrf.mxu0  ;;  %v1371_v13 = vpop.f32.mrf.mxu1 }
  0xca   :  { %1416 = vpow2.f32 %v1188_v8  ;;  %v1187_v14 = vmul.f32 -1.442695, %v350_v10  ;;  %v1219_v15 = vmul.f32 -1.442695, %v510_v11  ;;  %v365_v16 = vadd.f32 %v1323_v12, %v1954_v1 }
  0xcb   :  { %1418 = vpow2.f32 %v1220_v9  ;;  %v525_v17 = vadd.f32 %v1371_v13, %v1954_v1  ;;  %v359_v18 = vpop.f32.mrf.mxu0  ;;  %v519_v19 = vpop.f32.mrf.mxu1 }
  0xcc   :  { %1420 = vpow2.f32 %v1187_v14  ;;  %v1190_v20 = vmul.f32 -1.442695, %v365_v16  ;;  %v360_v21 = vadd.f32 %v1954_v1, %v359_v18  ;;  %v520_v22 = vadd.f32 %v1954_v1, %v519_v19 }
  0xcd   :  { %1422 = vpow2.f32 %v1219_v15  ;;  %v1222_v23 = vmul.f32 -1.442695, %v525_v17  ;;  %v1326_v24 = vpop.f32.mrf.mxu0  ;;  %v1374_v25 = vpop.f32.mrf.mxu1 }
  0xce   :  { %1424 = vpow2.f32 %v1190_v20  ;;  %v1189_v26 = vmul.f32 -1.442695, %v360_v21  ;;  %v1221_v27 = vmul.f32 -1.442695, %v520_v22  ;;  %v375_v28 = vadd.f32 %v1326_v24, %v1954_v1 }
  0xcf   :  { %1426 = vpow2.f32 %v1222_v23  ;;  %v535_v29 = vadd.f32 %v1374_v25, %v1954_v1  ;;  %v369_v30 = vpop.f32.mrf.mxu0  ;;  %v529_v31 = vpop.f32.mrf.mxu1 }
  0xd0   :  { %1428 = vpow2.f32 %v1189_v26  ;;  %v1192_v32 = vmul.f32 -1.442695, %v375_v28  ;;  %v370_v33 = vadd.f32 %v1954_v1, %v369_v30  ;;  %v530_v34 = vadd.f32 %v1954_v1, %v529_v31 }
  0xd1   :  { %1430 = vpow2.f32 %v1221_v27  ;;  %v1224_v35 = vmul.f32 -1.442695, %v535_v29  ;;  %v1329_v36 = vpop.f32.mrf.mxu0  ;;  %v1377_v37 = vpop.f32.mrf.mxu1 }
  0xd2   :  { %1432 = vpow2.f32 %v1192_v32  ;;  %v1191_v38 = vmul.f32 -1.442695, %v370_v33  ;;  %v1223_v39 = vmul.f32 -1.442695, %v530_v34  ;;  %v385_v40 = vadd.f32 %v1329_v36, %v1954_v1 }
  0xd3   :  { %1434 = vpow2.f32 %v1224_v35  ;;  %v545_v41 = vadd.f32 %v1377_v37, %v1954_v1  ;;  %v379_v42 = vpop.f32.mrf.mxu0  ;;  %v539_v43 = vpop.f32.mrf.mxu1 }
  0xd4   :  { %1436 = vpow2.f32 %v1191_v38  ;;  %v1194_v44 = vmul.f32 -1.442695, %v385_v40  ;;  %v380_v45 = vadd.f32 %v1954_v1, %v379_v42  ;;  %v540_v46 = vadd.f32 %v1954_v1, %v539_v43 }
  0xd5   :  { %1438 = vpow2.f32 %v1223_v39  ;;  %v1226_v47 = vmul.f32 -1.442695, %v545_v41  ;;  %v1332_v48 = vpop.f32.mrf.mxu0  ;;  %v1380_v49 = vpop.f32.mrf.mxu1 }
  0xd6   :  { %1440 = vpow2.f32 %v1194_v44  ;;  %v1193_v50 = vmul.f32 -1.442695, %v380_v45  ;;  %v1225_v51 = vmul.f32 -1.442695, %v540_v46  ;;  %v395_v19 = vadd.f32 %v1332_v48, %v1954_v1 }
  0xd7   :  { %v1417_v52 = vpop.eup %1416  ;;  %1442 = vpow2.f32 %v1226_v47  ;;  %v389_v53 = vpop.f32.mrf.mxu0  ;;  %v555_v23 = vadd.f32 %v1380_v49, %v1954_v1 }
  0xd8   :  { %v549_v54 = vpop.f32.mrf.mxu1  ;;  %v1419_v55 = vpop.eup %1418  ;;  %v861_v56 = vadd.f32 1.0, %v1417_v52  ;;  %1444 = vpow2.f32 %v1193_v50  ;;  %v390_v26 = vadd.f32 %v1954_v1, %v389_v53  ;;  %v1196_v33 = vmul.f32 -1.442695, %v395_v19 }
  0xd9   :  { %v1421_v57 = vpop.eup %1420  ;;  %v893_v58 = vadd.f32 1.0, %v1419_v55  ;;  %1446 = vpow2.f32 %v1225_v51  ;;  %v1335_v59 = vpop.f32.mrf.mxu0  ;;  %v550_v29 = vadd.f32 %v1954_v1, %v549_v54  ;;  %v1228_v38 = vmul.f32 -1.442695, %v555_v23 }
  0xda   :  { %v1423_v60 = vpop.eup %1422  ;;  %1448 = vrcp.f32 %v861_v56  ;;  %v860_v61 = vadd.f32 1.0, %v1421_v57  ;;  %v1383_v62 = vpop.f32.mrf.mxu1  ;;  %v405_v34 = vadd.f32 %v1335_v59, %v1954_v1  ;;  %v1195_v41 = vmul.f32 -1.442695, %v390_v26 }
  0xdb   :  { %v1425_v63 = vpop.eup %1424  ;;  %1450 = vrcp.f32 %v893_v58  ;;  %v892_v0 = vadd.f32 1.0, %v1423_v60  ;;  %v399_v6 = vpop.f32.mrf.mxu0  ;;  %v565_v39 = vadd.f32 %v1383_v62, %v1954_v1  ;;  %v1227_v44 = vmul.f32 -1.442695, %v550_v29 }
  0xdc   :  { %v1427_v2 = vpop.eup %1426  ;;  %1452 = vrcp.f32 %v860_v61  ;;  %v863_v3 = vadd.f32 1.0, %v1425_v63  ;;  %v559_v9 = vpop.f32.mrf.mxu1  ;;  %v400_v42 = vadd.f32 %v1954_v1, %v399_v6  ;;  %v1198_v48 = vmul.f32 -1.442695, %v405_v34 }
  0xdd   :  { %v1429_v4 = vpop.eup %1428  ;;  %1454 = vrcp.f32 %v892_v0  ;;  %v895_v5 = vadd.f32 1.0, %v1427_v2  ;;  %v1338_v16 = vpop.f32.mrf.mxu0  ;;  %v560_v45 = vadd.f32 %v1954_v1, %v559_v9  ;;  %v1230_v52 = vmul.f32 -1.442695, %v565_v39 }
  0xde   :  { %v1431_v7 = vpop.eup %1430  ;;  %1456 = vrcp.f32 %v863_v3  ;;  %v862_v8 = vadd.f32 1.0, %v1429_v4  ;;  %v1386_v20 = vpop.f32.mrf.mxu1  ;;  %v415_v49 = vadd.f32 %v1338_v16, %v1954_v1  ;;  %v1197_v55 = vmul.f32 -1.442695, %v400_v42 }
  0xdf   :  { %v1433_v10 = vpop.eup %1432  ;;  %1458 = vrcp.f32 %v895_v5  ;;  %v894_v11 = vadd.f32 1.0, %v1431_v7  ;;  %v409_v30 = vpop.f32.mrf.mxu0  ;;  %v575_v53 = vadd.f32 %v1386_v20, %v1954_v1  ;;  %v1229_v58 = vmul.f32 -1.442695, %v560_v45 }
  0xe0   :  { %v1435_v12 = vpop.eup %1434  ;;  %1460 = vrcp.f32 %v862_v8  ;;  %v865_v13 = vadd.f32 1.0, %v1433_v10  ;;  %v569_v35 = vpop.f32.mrf.mxu1  ;;  %v410_v56 = vadd.f32 %v1954_v1, %v409_v30  ;;  %v1200_v62 = vmul.f32 -1.442695, %v415_v49 }
  0xe1   :  { %v1437_v14 = vpop.eup %1436  ;;  %1462 = vrcp.f32 %v894_v11  ;;  %v897_v15 = vadd.f32 1.0, %v1435_v12  ;;  %v1341_v46 = vpop.f32.mrf.mxu0  ;;  %v570_v59 = vadd.f32 %v1954_v1, %v569_v35  ;;  %v1232_v3 = vmul.f32 -1.442695, %v575_v53 }
  0xe2   :  { %v1439_v17 = vpop.eup %1438  ;;  %1464 = vrcp.f32 %v865_v13  ;;  %v864_v18 = vadd.f32 1.0, %v1437_v14  ;;  %v1389_v50 = vpop.f32.mrf.mxu1  ;;  %v425_v63 = vadd.f32 %v1341_v46, %v1954_v1  ;;  %v1199_v6 = vmul.f32 -1.442695, %v410_v56 }
  0xe3   :  { %v1441_v21 = vpop.eup %1440  ;;  %1466 = vrcp.f32 %v897_v15  ;;  %v896_v22 = vadd.f32 1.0, %v1439_v17  ;;  %v419_v60 = vpop.f32.mrf.mxu0  ;;  %v585_v4 = vadd.f32 %v1389_v50, %v1954_v1  ;;  %v1231_v9 = vmul.f32 -1.442695, %v570_v59 }
  0xe4   :  { %v1443_v24 = vpop.eup %1442  ;;  %1468 = vrcp.f32 %v864_v18  ;;  %v867_v25 = vadd.f32 1.0, %v1441_v21  ;;  %v579_v0 = vpop.f32.mrf.mxu1  ;;  %v420_v7 = vadd.f32 %v1954_v1, %v419_v60  ;;  %v1202_v13 = vmul.f32 -1.442695, %v425_v63 }
  0xe5   :  { %v1445_v27 = vpop.eup %1444  ;;  %1470 = vrcp.f32 %v896_v22  ;;  %v899_v28 = vadd.f32 1.0, %v1443_v24  ;;  %v580_v10 = vadd.f32 %v1954_v1, %v579_v0  ;;  %v2028_v11 = vpop.f32.mrf.mxu0  ;;  %v1234_v16 = vmul.f32 -1.442695, %v585_v4 }
  0xe6   :  { %v1447_v31 = vpop.eup %1446  ;;  %1472 = vrcp.f32 %v867_v25  ;;  %v866_v32 = vadd.f32 1.0, %v1445_v27  ;;  %v2034_v14 = vpop.f32.mrf.mxu1  ;;  %v1201_v18 = vmul.f32 -1.442695, %v420_v7 }
  0xe7   :  { %v1449_v36 = vpop.eup %1448  ;;  %1474 = vrcp.f32 %v899_v28  ;;  %v898_v37 = vadd.f32 1.0, %v1447_v31  ;;  %v1233_v20 = vmul.f32 -1.442695, %v580_v10  ;;  %v429_v21 = vpop.f32.mrf.mxu0  ;;  %v595_v56 = vadd.f32 %v2034_v14, %v1954_v1 }
  0xe8   :  { %v1451_v40 = vpop.eup %1450  ;;  %1054 = vst.msk [vmem:[%s2291_s3 + $0x8] sm:$0xff] %vm1052_vm2, %v1449_v36  ;;  %1476 = vrcp.f32 %v866_v32  ;;  %v589_v23 = vpop.f32.mrf.mxu1  ;;  %v430_v59 = vadd.f32 %v1954_v1, %v429_v21 }
  0xe9   :  { %v1453_v43 = vpop.eup %1452  ;;  %1086 = vst.msk [vmem:[%s2291_s3 + $0x108] sm:$0xff] %vm1052_vm2, %v1451_v40  ;;  %1478 = vrcp.f32 %v898_v37  ;;  %v1347_v29 = vpop.f32.mrf.mxu0 }
  0xea   :  { %v1455_v47 = vpop.eup %1454  ;;  %1053 = vst.msk [vmem:[%s2291_s3] sm:$0xff] %vm1052_vm2, %v1453_v43  ;;  %1480 = vpow2.f32 %v1196_v33  ;;  %v1395_v32 = vpop.f32.mrf.mxu1  ;;  %v445_v4 = vadd.f32 %v1347_v29, %v1954_v1 }
  0xeb   :  { %v1457_v51 = vpop.eup %1456  ;;  %1085 = vst.msk [vmem:[%s2291_s3 + $0x100] sm:$0xff] %vm1052_vm2, %v1455_v47  ;;  %1482 = vpow2.f32 %v1228_v38  ;;  %v439_v39 = vpop.f32.mrf.mxu0 }
  0xec   :  { %v1459_v54 = vpop.eup %1458  ;;  %1056 = vst.msk [vmem:[%s2291_s3 + $0x18] sm:$0xff] %vm1052_vm2, %v1457_v51  ;;  %1484 = vpow2.f32 %v1195_v41  ;;  %v599_v42 = vpop.f32.mrf.mxu1 }
  0xed   :  { %v1461_v57 = vpop.eup %1460  ;;  %1088 = vst.msk [vmem:[%s2291_s3 + $0x118] sm:$0xff] %vm1052_vm2, %v1459_v54  ;;  %1486 = vpow2.f32 %v1227_v44  ;;  %v1350_v49 = vpop.f32.mrf.mxu0 }
  0xee   :  { %v1463_v61 = vpop.eup %1462  ;;  %1055 = vst.msk [vmem:[%s2291_s3 + $0x10] sm:$0xff] %vm1052_vm2, %v1461_v57  ;;  %1488 = vpow2.f32 %v1198_v48  ;;  %v1398_v53 = vpop.f32.mrf.mxu1 }
  0xef   :  { %v1465_v2 = vpop.eup %1464  ;;  %1087 = vst.msk [vmem:[%s2291_s3 + $0x110] sm:$0xff] %vm1052_vm2, %v1463_v61  ;;  %1490 = vpow2.f32 %v1230_v52  ;;  %v435_v52 = vadd.f32 %v2028_v11, %v1954_v1  ;;  %v449_v63 = vpop.f32.mrf.mxu0  ;;  %v1203_v11 = vmul.f32 -1.442695, %v430_v59 }
  0xf0   :  { %v1467_v5 = vpop.eup %1466  ;;  %1058 = vst.msk [vmem:[%s2291_s3 + $0x28] sm:$0xff] %vm1052_vm2, %v1465_v2  ;;  %1492 = vpow2.f32 %v1197_v55 }
  0xf1   :  { %v1469_v8 = vpop.eup %1468  ;;  %1090 = vst.msk [vmem:[%s2291_s3 + $0x128] sm:$0xff] %vm1052_vm2, %v1467_v5  ;;  %1494 = vpow2.f32 %v1229_v58  ;;  %v609_v5 = vpop.f32.mrf.mxu1 }
  0xf2   :  { %v1471_v12 = vpop.eup %1470  ;;  %1057 = vst.msk [vmem:[%s2291_s3 + $0x20] sm:$0xff] %vm1052_vm2, %v1469_v8  ;;  %1496 = vpow2.f32 %v1200_v62  ;;  %v590_v62 = vadd.f32 %v1954_v1, %v589_v23  ;;  %v1236_v8 = vmul.f32 -1.442695, %v595_v56  ;;  %v615_v23 = vadd.f32 %v1398_v53, %v1954_v1 }
  0xf3   :  { %v1473_v15 = vpop.eup %1472  ;;  %1089 = vst.msk [vmem:[%s2291_s3 + $0x120] sm:$0xff] %vm1052_vm2, %v1471_v12  ;;  %1498 = vpow2.f32 %v1232_v3  ;;  %v1204_v3 = vmul.f32 -1.442695, %v435_v52  ;;  %v440_v12 = vadd.f32 %v1954_v1, %v439_v39  ;;  %v610_v29 = vadd.f32 %v1954_v1, %v609_v5 }
  0xf4   :  { %v1475_v17 = vpop.eup %1474  ;;  %1060 = vst.msk [vmem:[%s2291_s3 + $0x38] sm:$0xff] %vm1052_vm2, %v1473_v15  ;;  %1500 = vpow2.f32 %v1199_v6  ;;  %v1235_v14 = vmul.f32 -1.442695, %v590_v62  ;;  %v600_v15 = vadd.f32 %v1954_v1, %v599_v42 }
  0xf5   :  { %v1477_v19 = vpop.eup %1476  ;;  %1092 = vst.msk [vmem:[%s2291_s3 + $0x138] sm:$0xff] %vm1052_vm2, %v1475_v17  ;;  %1502 = vpow2.f32 %v1231_v9  ;;  %v605_v9 = vadd.f32 %v1395_v32, %v1954_v1  ;;  %v1239_v42 = vmul.f32 -1.442695, %v610_v29 }
  0xf6   :  { %v1479_v22 = vpop.eup %1478  ;;  %1059 = vst.msk [vmem:[%s2291_s3 + $0x30] sm:$0xff] %vm1052_vm2, %v1477_v19  ;;  %1504 = vpow2.f32 %v1202_v13  ;;  %v455_v19 = vadd.f32 %v1350_v49, %v1954_v1 }
  0xf7   :  { %v1481_v24 = vpop.eup %1480  ;;  %1091 = vst.msk [vmem:[%s2291_s3 + $0x130] sm:$0xff] %vm1052_vm2, %v1479_v22  ;;  %1506 = vpow2.f32 %v1234_v16  ;;  %v1353_v16 = vpop.f32.mrf.mxu0  ;;  %v1238_v22 = vmul.f32 -1.442695, %v605_v9 }
  0xf8   :  { %v1483_v25 = vpop.eup %1482  ;;  %v869_v26 = vadd.f32 1.0, %v1481_v24  ;;  %1508 = vpow2.f32 %v1201_v18  ;;  %v1206_v18 = vmul.f32 -1.442695, %v445_v4  ;;  %v1208_v32 = vmul.f32 -1.442695, %v455_v19 }
  0xf9   :  { %v1485_v27 = vpop.eup %1484  ;;  %v901_v28 = vadd.f32 1.0, %v1483_v25  ;;  %1510 = vpow2.f32 %v1233_v20  ;;  %v1401_v20 = vpop.f32.mrf.mxu1  ;;  %v1205_v25 = vmul.f32 -1.442695, %v440_v12 }
  0xfa   :  { %v1487_v30 = vpop.eup %1486  ;;  %1512 = vrcp.f32 %v869_v26  ;;  %v868_v31 = vadd.f32 1.0, %v1485_v27  ;;  %v450_v26 = vadd.f32 %v1954_v1, %v449_v63 }
  0xfb   :  { %v1489_v33 = vpop.eup %1488  ;;  %1514 = vrcp.f32 %v901_v28  ;;  %v900_v34 = vadd.f32 1.0, %v1487_v30  ;;  %v1237_v28 = vmul.f32 -1.442695, %v600_v15  ;;  %v459_v30 = vpop.f32.mrf.mxu0 }
  0xfc   :  { %v1491_v35 = vpop.eup %1490  ;;  %1516 = vrcp.f32 %v868_v31  ;;  %v871_v36 = vadd.f32 1.0, %v1489_v33  ;;  %v465_v33 = vadd.f32 %v1353_v16, %v1954_v1  ;;  %v1207_v39 = vmul.f32 -1.442695, %v450_v26 }
  0xfd   :  { %v1493_v37 = vpop.eup %1492  ;;  %1518 = vrcp.f32 %v900_v34  ;;  %v903_v38 = vadd.f32 1.0, %v1491_v35  ;;  %v619_v34 = vpop.f32.mrf.mxu1 }
  0xfe   :  { %v1495_v40 = vpop.eup %1494  ;;  %1520 = vrcp.f32 %v871_v36  ;;  %v870_v41 = vadd.f32 1.0, %v1493_v37  ;;  %v1240_v36 = vmul.f32 -1.442695, %v615_v23  ;;  %v625_v37 = vadd.f32 %v1401_v20, %v1954_v1 }
  0xff   :  { %v1497_v43 = vpop.eup %1496  ;;  %1522 = vrcp.f32 %v903_v38  ;;  %v902_v44 = vadd.f32 1.0, %v1495_v40  ;;  %v460_v40 = vadd.f32 %v1954_v1, %v459_v30 }
 0x100   :  { %v1499_v45 = vpop.eup %1498  ;;  %1524 = vrcp.f32 %v870_v41  ;;  %v873_v46 = vadd.f32 1.0, %v1497_v43  ;;  %v620_v43 = vadd.f32 %v1954_v1, %v619_v34  ;;  %v1242_v49 = vmul.f32 -1.442695, %v625_v37 }
 0x101   :  { %v1501_v47 = vpop.eup %1500  ;;  %1526 = vrcp.f32 %v902_v44  ;;  %v905_v48 = vadd.f32 1.0, %v1499_v45  ;;  %v2114_v44 = vpop.f32.mrf.mxu0 }
 0x102   :  { %v1503_v50 = vpop.eup %1502  ;;  %1528 = vrcp.f32 %v873_v46  ;;  %v872_v51 = vadd.f32 1.0, %v1501_v47  ;;  %v1210_v46 = vmul.f32 -1.442695, %v465_v33  ;;  %v2120_v47 = vpop.f32.mrf.mxu1  ;;  %v1241_v53 = vmul.f32 -1.442695, %v620_v43 }
 0x103   :  { %v1505_v54 = vpop.eup %1504  ;;  %1530 = vrcp.f32 %v905_v48  ;;  %v904_v55 = vadd.f32 1.0, %v1503_v50  ;;  %v635_v26 = vadd.f32 %v2120_v47, %v1954_v1 }
 0x104   :  { %v1507_v57 = vpop.eup %1506  ;;  %1532 = vrcp.f32 %v872_v51  ;;  %v875_v58 = vadd.f32 1.0, %v1505_v54  ;;  %v1209_v51 = vmul.f32 -1.442695, %v460_v40  ;;  %v469_v54 = vpop.f32.mrf.mxu0 }
 0x105   :  { %v1509_v60 = vpop.eup %1508  ;;  %1534 = vrcp.f32 %v904_v55  ;;  %v907_v61 = vadd.f32 1.0, %v1507_v57  ;;  %v629_v56 = vpop.f32.mrf.mxu1  ;;  %v470_v29 = vadd.f32 %v1954_v1, %v469_v54 }
 0x106   :  { %v1511_v0 = vpop.eup %1510  ;;  %1536 = vrcp.f32 %v875_v58  ;;  %v874_v2 = vadd.f32 1.0, %v1509_v60  ;;  %v1359_v62 = vpop.f32.mrf.mxu0 }
 0x107   :  { %v1513_v6 = vpop.eup %1512  ;;  %1538 = vrcp.f32 %v907_v61  ;;  %v906_v7 = vadd.f32 1.0, %v1511_v0  ;;  %v485_v37 = vadd.f32 %v1359_v62, %v1954_v1 }
 0x108   :  { %v1515_v10 = vpop.eup %1514  ;;  %1062 = vst.msk [vmem:[%s2291_s3 + $0x48] sm:$0xff] %vm1052_vm2, %v1513_v6  ;;  %1540 = vrcp.f32 %v874_v2  ;;  %v1407_v2 = vpop.f32.mrf.mxu1 }
 0x109   :  { %v1517_v13 = vpop.eup %1516  ;;  %1094 = vst.msk [vmem:[%s2291_s3 + $0x148] sm:$0xff] %vm1052_vm2, %v1515_v10  ;;  %1542 = vrcp.f32 %v906_v7  ;;  %v479_v9 = vpop.f32.mrf.mxu0 }
 0x10a   :  { %v1519_v17 = vpop.eup %1518  ;;  %1061 = vst.msk [vmem:[%s2291_s3 + $0x40] sm:$0xff] %vm1052_vm2, %v1517_v13  ;;  %1544 = vpow2.f32 %v1204_v3  ;;  %v639_v12 = vpop.f32.mrf.mxu1 }
 0x10b   :  { %v1521_v21 = vpop.eup %1520  ;;  %1093 = vst.msk [vmem:[%s2291_s3 + $0x140] sm:$0xff] %vm1052_vm2, %v1519_v17  ;;  %1546 = vpow2.f32 %v1236_v8  ;;  %v1362_v19 = vpop.f32.mrf.mxu0 }
 0x10c   :  { %v1523_v24 = vpop.eup %1522  ;;  %1064 = vst.msk [vmem:[%s2291_s3 + $0x58] sm:$0xff] %vm1052_vm2, %v1521_v21  ;;  %1548 = vpow2.f32 %v1203_v11  ;;  %v1410_v23 = vpop.f32.mrf.mxu1 }
 0x10d   :  { %v1525_v27 = vpop.eup %1524  ;;  %1096 = vst.msk [vmem:[%s2291_s3 + $0x158] sm:$0xff] %vm1052_vm2, %v1523_v24  ;;  %1550 = vpow2.f32 %v1235_v14  ;;  %v489_v33 = vpop.f32.mrf.mxu0 }
 0x10e   :  { %v1527_v31 = vpop.eup %1526  ;;  %1063 = vst.msk [vmem:[%s2291_s3 + $0x50] sm:$0xff] %vm1052_vm2, %v1525_v27  ;;  %1552 = vpow2.f32 %v1206_v18 }
 0x10f   :  { %v1529_v35 = vpop.eup %1528  ;;  %1095 = vst.msk [vmem:[%s2291_s3 + $0x150] sm:$0xff] %vm1052_vm2, %v1527_v31  ;;  %1554 = vpow2.f32 %v1238_v22  ;;  %v475_v22 = vadd.f32 %v2114_v44, %v1954_v1  ;;  %v1211_v44 = vmul.f32 -1.442695, %v470_v29 }
 0x110   :  { %v1531_v38 = vpop.eup %1530  ;;  %1066 = vst.msk [vmem:[%s2291_s3 + $0x68] sm:$0xff] %vm1052_vm2, %v1529_v35  ;;  %1556 = vpow2.f32 %v1205_v25 }
 0x111   :  { %v1533_v41 = vpop.eup %1532  ;;  %1098 = vst.msk [vmem:[%s2291_s3 + $0x168] sm:$0xff] %vm1052_vm2, %v1531_v38  ;;  %1558 = vpow2.f32 %v1237_v28  ;;  %v649_v38 = vpop.f32.mrf.mxu1 }
 0x112   :  { %v1535_v45 = vpop.eup %1534  ;;  %1065 = vst.msk [vmem:[%s2291_s3 + $0x60] sm:$0xff] %vm1052_vm2, %v1533_v41  ;;  %1560 = vpow2.f32 %v1208_v32  ;;  %v630_v32 = vadd.f32 %v1954_v1, %v629_v56  ;;  %v1244_v41 = vmul.f32 -1.442695, %v635_v26  ;;  %v655_v56 = vadd.f32 %v1410_v23, %v1954_v1 }
 0x113   :  { %v1537_v48 = vpop.eup %1536  ;;  %1097 = vst.msk [vmem:[%s2291_s3 + $0x160] sm:$0xff] %vm1052_vm2, %v1535_v45  ;;  %1562 = vpow2.f32 %v1240_v36  ;;  %v1212_v36 = vmul.f32 -1.442695, %v475_v22  ;;  %v480_v45 = vadd.f32 %v1954_v1, %v479_v9  ;;  %v650_v62 = vadd.f32 %v1954_v1, %v649_v38 }
 0x114   :  { %v1539_v50 = vpop.eup %1538  ;;  %1068 = vst.msk [vmem:[%s2291_s3 + $0x78] sm:$0xff] %vm1052_vm2, %v1537_v48  ;;  %1564 = vpow2.f32 %v1207_v39  ;;  %v1243_v47 = vmul.f32 -1.442695, %v630_v32  ;;  %v640_v48 = vadd.f32 %v1954_v1, %v639_v12 }
 0x115   :  { %v1541_v52 = vpop.eup %1540  ;;  %1100 = vst.msk [vmem:[%s2291_s3 + $0x178] sm:$0xff] %vm1052_vm2, %v1539_v50  ;;  %1566 = vpow2.f32 %v1239_v42  ;;  %v645_v42 = vadd.f32 %v1407_v2, %v1954_v1  ;;  %v1247_v12 = vmul.f32 -1.442695, %v650_v62 }
 0x116   :  { %v1543_v55 = vpop.eup %1542  ;;  %1067 = vst.msk [vmem:[%s2291_s3 + $0x70] sm:$0xff] %vm1052_vm2, %v1541_v52  ;;  %1568 = vpow2.f32 %v1210_v46  ;;  %v495_v52 = vadd.f32 %v1362_v19, %v1954_v1 }
 0x117   :  { %v1545_v57 = vpop.eup %1544  ;;  %1099 = vst.msk [vmem:[%s2291_s3 + $0x170] sm:$0xff] %vm1052_vm2, %v1543_v55  ;;  %1570 = vpow2.f32 %v1242_v49  ;;  %v1365_v49 = vpop.f32.mrf.mxu0  ;;  %v1246_v55 = vmul.f32 -1.442695, %v645_v42 }
 0x118   :  { %v1547_v58 = vpop.eup %1546  ;;  %v877_v59 = vadd.f32 1.0, %v1545_v57  ;;  %1572 = vpow2.f32 %v1209_v51  ;;  %v1214_v51 = vmul.f32 -1.442695, %v485_v37  ;;  %v1216_v2 = vmul.f32 -1.442695, %v495_v52 }
 0x119   :  { %v1549_v60 = vpop.eup %1548  ;;  %v909_v61 = vadd.f32 1.0, %v1547_v58  ;;  %1574 = vpow2.f32 %v1241_v53  ;;  %v1413_v53 = vpop.f32.mrf.mxu1  ;;  %v1213_v58 = vmul.f32 -1.442695, %v480_v45 }
 0x11a   :  { %v1551_v63 = vpop.eup %1550  ;;  %1576 = vrcp.f32 %v877_v59  ;;  %v876_v0 = vadd.f32 1.0, %v1549_v60  ;;  %v490_v59 = vadd.f32 %v1954_v1, %v489_v33 }
 0x11b   :  { %v1553_v3 = vpop.eup %1552  ;;  %1578 = vrcp.f32 %v909_v61  ;;  %v908_v4 = vadd.f32 1.0, %v1551_v63  ;;  %v1245_v61 = vmul.f32 -1.442695, %v640_v48  ;;  %v499_v63 = vpop.f32.mrf.mxu0 }
 0x11c   :  { %v1555_v5 = vpop.eup %1554  ;;  %1580 = vrcp.f32 %v876_v0  ;;  %v879_v6 = vadd.f32 1.0, %v1553_v3  ;;  %v505_v3 = vadd.f32 %v1365_v49, %v1954_v1  ;;  %v1215_v9 = vmul.f32 -1.442695, %v490_v59 }
 0x11d   :  { %v1557_v7 = vpop.eup %1556  ;;  %1582 = vrcp.f32 %v908_v4  ;;  %v911_v8 = vadd.f32 1.0, %v1555_v5  ;;  %v659_v4 = vpop.f32.mrf.mxu1 }
 0x11e   :  { %v1559_v10 = vpop.eup %1558  ;;  %1584 = vrcp.f32 %v879_v6  ;;  %v878_v11 = vadd.f32 1.0, %v1557_v7  ;;  %v1248_v6 = vmul.f32 -1.442695, %v655_v56  ;;  %v665_v7 = vadd.f32 %v1413_v53, %v1954_v1 }
 0x11f   :  { %v1561_v13 = vpop.eup %1560  ;;  %1586 = vrcp.f32 %v911_v8  ;;  %v910_v14 = vadd.f32 1.0, %v1559_v10  ;;  %v500_v10 = vadd.f32 %v1954_v1, %v499_v63 }
 0x120   :  { %v1563_v15 = vpop.eup %1562  ;;  %1588 = vrcp.f32 %v878_v11  ;;  %v881_v16 = vadd.f32 1.0, %v1561_v13  ;;  %v660_v13 = vadd.f32 %v1954_v1, %v659_v4 }
 0x121   :  { %v1565_v17 = vpop.eup %1564  ;;  %1590 = vrcp.f32 %v910_v14  ;;  %v913_v18 = vadd.f32 1.0, %v1563_v15  ;;  %v1218_v15 = vmul.f32 -1.442695, %v505_v3  ;;  %v1217_v1 = vmul.f32 -1.442695, %v500_v10 }
 0x122   :  { %v1567_v20 = vpop.eup %1566  ;;  %1592 = vrcp.f32 %v881_v16  ;;  %v880_v21 = vadd.f32 1.0, %v1565_v17  ;;  %v1250_v17 = vmul.f32 -1.442695, %v665_v7 }
 0x123   :  { %v1569_v24 = vpop.eup %1568  ;;  %1594 = vrcp.f32 %v913_v18  ;;  %v912_v25 = vadd.f32 1.0, %v1567_v20  ;;  %v1249_v20 = vmul.f32 -1.442695, %v660_v13 }
 0x124   :  { %v1571_v27 = vpop.eup %1570  ;;  %1596 = vrcp.f32 %v880_v21  ;;  %v883_v28 = vadd.f32 1.0, %v1569_v24 }
 0x125   :  { %v1573_v30 = vpop.eup %1572  ;;  %1598 = vrcp.f32 %v912_v25  ;;  %v915_v31 = vadd.f32 1.0, %v1571_v27 }
 0x126   :  { %v1575_v34 = vpop.eup %1574  ;;  %1600 = vrcp.f32 %v883_v28  ;;  %v882_v35 = vadd.f32 1.0, %v1573_v30 }
 0x127   :  { %v1577_v39 = vpop.eup %1576  ;;  %1602 = vrcp.f32 %v915_v31  ;;  %v914_v40 = vadd.f32 1.0, %v1575_v34 }
 0x128   :  { %v1579_v43 = vpop.eup %1578  ;;  %1070 = vst.msk [vmem:[%s2291_s3 + $0x88] sm:$0xff] %vm1052_vm2, %v1577_v39  ;;  %1604 = vrcp.f32 %v882_v35 }
 0x129   :  { %v1581_v46 = vpop.eup %1580  ;;  %1102 = vst.msk [vmem:[%s2291_s3 + $0x188] sm:$0xff] %vm1052_vm2, %v1579_v43  ;;  %1606 = vrcp.f32 %v914_v40 }
 0x12a   :  { %v1583_v50 = vpop.eup %1582  ;;  %1069 = vst.msk [vmem:[%s2291_s3 + $0x80] sm:$0xff] %vm1052_vm2, %v1581_v46  ;;  %1608 = vpow2.f32 %v1212_v36 }
 0x12b   :  { %v1585_v54 = vpop.eup %1584  ;;  %1101 = vst.msk [vmem:[%s2291_s3 + $0x180] sm:$0xff] %vm1052_vm2, %v1583_v50  ;;  %1610 = vpow2.f32 %v1244_v41 }
 0x12c   :  { %v1587_v57 = vpop.eup %1586  ;;  %1072 = vst.msk [vmem:[%s2291_s3 + $0x98] sm:$0xff] %vm1052_vm2, %v1585_v54  ;;  %1612 = vpow2.f32 %v1211_v44 }
 0x12d   :  { %v1589_v60 = vpop.eup %1588  ;;  %1104 = vst.msk [vmem:[%s2291_s3 + $0x198] sm:$0xff] %vm1052_vm2, %v1587_v57  ;;  %1614 = vpow2.f32 %v1243_v47 }
 0x12e   :  { %v1591_v0 = vpop.eup %1590  ;;  %1071 = vst.msk [vmem:[%s2291_s3 + $0x90] sm:$0xff] %vm1052_vm2, %v1589_v60  ;;  %1616 = vpow2.f32 %v1214_v51 }
 0x12f   :  { %v1593_v5 = vpop.eup %1592  ;;  %1103 = vst.msk [vmem:[%s2291_s3 + $0x190] sm:$0xff] %vm1052_vm2, %v1591_v0  ;;  %1618 = vpow2.f32 %v1246_v55 }
 0x130   :  { %v1595_v8 = vpop.eup %1594  ;;  %1074 = vst.msk [vmem:[%s2291_s3 + $0xa8] sm:$0xff] %vm1052_vm2, %v1593_v5  ;;  %1620 = vpow2.f32 %v1213_v58 }
 0x131   :  { %v1597_v11 = vpop.eup %1596  ;;  %1106 = vst.msk [vmem:[%s2291_s3 + $0x1a8] sm:$0xff] %vm1052_vm2, %v1595_v8  ;;  %1622 = vpow2.f32 %v1245_v61 }
 0x132   :  { %v1599_v14 = vpop.eup %1598  ;;  %1073 = vst.msk [vmem:[%s2291_s3 + $0xa0] sm:$0xff] %vm1052_vm2, %v1597_v11  ;;  %1624 = vpow2.f32 %v1216_v2 }
 0x133   :  { %v1601_v16 = vpop.eup %1600  ;;  %1105 = vst.msk [vmem:[%s2291_s3 + $0x1a0] sm:$0xff] %vm1052_vm2, %v1599_v14  ;;  %1626 = vpow2.f32 %v1248_v6 }
 0x134   :  { %v1603_v18 = vpop.eup %1602  ;;  %1076 = vst.msk [vmem:[%s2291_s3 + $0xb8] sm:$0xff] %vm1052_vm2, %v1601_v16  ;;  %1628 = vpow2.f32 %v1215_v9 }
 0x135   :  { %v1605_v19 = vpop.eup %1604  ;;  %1108 = vst.msk [vmem:[%s2291_s3 + $0x1b8] sm:$0xff] %vm1052_vm2, %v1603_v18  ;;  %1630 = vpow2.f32 %v1247_v12 }
 0x136   :  { %v1607_v21 = vpop.eup %1606  ;;  %1075 = vst.msk [vmem:[%s2291_s3 + $0xb0] sm:$0xff] %vm1052_vm2, %v1605_v19  ;;  %1632 = vpow2.f32 %v1218_v15 }
 0x137   :  { %v1609_v22 = vpop.eup %1608  ;;  %1107 = vst.msk [vmem:[%s2291_s3 + $0x1b0] sm:$0xff] %vm1052_vm2, %v1607_v21  ;;  %1634 = vpow2.f32 %v1250_v17 }
 0x138   :  { %v1611_v23 = vpop.eup %1610  ;;  %v885_v24 = vadd.f32 1.0, %v1609_v22  ;;  %1636 = vpow2.f32 %v1217_v1 }
 0x139   :  { %v1613_v25 = vpop.eup %1612  ;;  %v917_v26 = vadd.f32 1.0, %v1611_v23  ;;  %1638 = vpow2.f32 %v1249_v20 }
 0x13a   :  { %v1615_v27 = vpop.eup %1614  ;;  %1640 = vrcp.f32 %v885_v24  ;;  %v884_v28 = vadd.f32 1.0, %v1613_v25 }
 0x13b   :  { %v1617_v29 = vpop.eup %1616  ;;  %1642 = vrcp.f32 %v917_v26  ;;  %v916_v30 = vadd.f32 1.0, %v1615_v27 }
 0x13c   :  { %v1619_v31 = vpop.eup %1618  ;;  %1644 = vrcp.f32 %v884_v28  ;;  %v887_v32 = vadd.f32 1.0, %v1617_v29 }
 0x13d   :  { %v1621_v33 = vpop.eup %1620  ;;  %1646 = vrcp.f32 %v916_v30  ;;  %v919_v34 = vadd.f32 1.0, %v1619_v31 }
 0x13e   :  { %v1623_v35 = vpop.eup %1622  ;;  %1648 = vrcp.f32 %v887_v32  ;;  %v886_v36 = vadd.f32 1.0, %v1621_v33 }
 0x13f   :  { %v1625_v37 = vpop.eup %1624  ;;  %1650 = vrcp.f32 %v919_v34  ;;  %v918_v38 = vadd.f32 1.0, %v1623_v35 }
 0x140   :  { %v1627_v39 = vpop.eup %1626  ;;  %1652 = vrcp.f32 %v886_v36  ;;  %v889_v40 = vadd.f32 1.0, %v1625_v37 }
 0x141   :  { %v1629_v41 = vpop.eup %1628  ;;  %1654 = vrcp.f32 %v918_v38  ;;  %v921_v42 = vadd.f32 1.0, %v1627_v39 }
 0x142   :  { %v1631_v43 = vpop.eup %1630  ;;  %1656 = vrcp.f32 %v889_v40  ;;  %v888_v44 = vadd.f32 1.0, %v1629_v41 }
 0x143   :  { %v1633_v45 = vpop.eup %1632  ;;  %1658 = vrcp.f32 %v921_v42  ;;  %v920_v46 = vadd.f32 1.0, %v1631_v43 }
 0x144   :  { %v1635_v47 = vpop.eup %1634  ;;  %1660 = vrcp.f32 %v888_v44  ;;  %v891_v48 = vadd.f32 1.0, %v1633_v45 }
 0x145   :  { %v1637_v49 = vpop.eup %1636  ;;  %1662 = vrcp.f32 %v920_v46  ;;  %v923_v50 = vadd.f32 1.0, %v1635_v47 }
 0x146   :  { %v1639_v51 = vpop.eup %1638  ;;  %1664 = vrcp.f32 %v891_v48  ;;  %v890_v52 = vadd.f32 1.0, %v1637_v49 }
 0x147   :  { %v1641_v53 = vpop.eup %1640  ;;  %1666 = vrcp.f32 %v923_v50  ;;  %v922_v54 = vadd.f32 1.0, %v1639_v51 }
 0x148   :  { %v1643_v55 = vpop.eup %1642  ;;  %1078 = vst.msk [vmem:[%s2291_s3 + $0xc8] sm:$0xff] %vm1052_vm2, %v1641_v53  ;;  %1668 = vrcp.f32 %v890_v52 }
 0x149   :  { %v1645_v56 = vpop.eup %1644  ;;  %1110 = vst.msk [vmem:[%s2291_s3 + $0x1c8] sm:$0xff] %vm1052_vm2, %v1643_v55  ;;  %1670 = vrcp.f32 %v922_v54 }
 0x14a   :  { %v1647_v57 = vpop.eup %1646  ;;  %1077 = vst.msk [vmem:[%s2291_s3 + $0xc0] sm:$0xff] %vm1052_vm2, %v1645_v56 }
 0x14b   :  { %v1649_v58 = vpop.eup %1648  ;;  %1109 = vst.msk [vmem:[%s2291_s3 + $0x1c0] sm:$0xff] %vm1052_vm2, %v1647_v57 }
 0x14c   :  { %v1651_v59 = vpop.eup %1650  ;;  %1080 = vst.msk [vmem:[%s2291_s3 + $0xd8] sm:$0xff] %vm1052_vm2, %v1649_v58 }
 0x14d   :  { %v1653_v60 = vpop.eup %1652  ;;  %1112 = vst.msk [vmem:[%s2291_s3 + $0x1d8] sm:$0xff] %vm1052_vm2, %v1651_v59 }
 0x14e   :  { %v1655_v61 = vpop.eup %1654  ;;  %1079 = vst.msk [vmem:[%s2291_s3 + $0xd0] sm:$0xff] %vm1052_vm2, %v1653_v60 }
 0x14f   :  { %v1657_v62 = vpop.eup %1656  ;;  %1111 = vst.msk [vmem:[%s2291_s3 + $0x1d0] sm:$0xff] %vm1052_vm2, %v1655_v61 }
 0x150   :  { %v1659_v63 = vpop.eup %1658  ;;  %1082 = vst.msk [vmem:[%s2291_s3 + $0xe8] sm:$0xff] %vm1052_vm2, %v1657_v62 }
 0x151   :  { %v1661_v0 = vpop.eup %1660  ;;  %1114 = vst.msk [vmem:[%s2291_s3 + $0x1e8] sm:$0xff] %vm1052_vm2, %v1659_v63 }
 0x152   :  { %v1663_v2 = vpop.eup %1662  ;;  %1081 = vst.msk [vmem:[%s2291_s3 + $0xe0] sm:$0xff] %vm1052_vm2, %v1661_v0 }
 0x153   :  { %v1665_v3 = vpop.eup %1664  ;;  %1113 = vst.msk [vmem:[%s2291_s3 + $0x1e0] sm:$0xff] %vm1052_vm2, %v1663_v2 }
 0x154   :  { %v1667_v4 = vpop.eup %1666  ;;  %1084 = vst.msk [vmem:[%s2291_s3 + $0xf8] sm:$0xff] %vm1052_vm2, %v1665_v3 }
 0x155   :  { %v1669_v5 = vpop.eup %1668  ;;  %1116 = vst.msk [vmem:[%s2291_s3 + $0x1f8] sm:$0xff] %vm1052_vm2, %v1667_v4 }
 0x156   :  { %v1671_v6 = vpop.eup %1670  ;;  %1083 = vst.msk [vmem:[%s2291_s3 + $0xf0] sm:$0xff] %vm1052_vm2, %v1669_v5 }
 0x157   :  { %1115 = vst.msk [vmem:[%s2291_s3 + $0x1f0] sm:$0xff] %vm1052_vm2, %v1671_v6 }

</bundles_post_ra>
